<compile_context>
chip_gen: v5e
topology: v5e:2x2
jax: 0.10.0
libtpu: 0.0.40
codegen_flags: <defaults>
</compile_context>

<pallas_src>
import functools
import math

import jax
import jax.numpy as jnp
from jax.experimental import pallas as pl
from jax.experimental.pallas import tpu as pltpu


# ----------------------------------------------------------------------------
# Kernel: one (batch-tile, layer) grid step.
# ----------------------------------------------------------------------------
def _encoder_step_kernel(q_ref, k_ref, v_ref, mask_ref,
                         wq_ref, wk_ref, wv_ref, bq_ref, bk_ref, bv_ref,
                         wo_ref, bo_ref,
                         w1_ref, b1_ref, w2_ref, b2_ref,
                         g1_ref, be1_ref, g2_ref, be2_ref,
                         out_ref, *opt_out_refs,
                         nhead, res1, res2, eps, block_b, seq):
    attnw_ref = opt_out_refs[0] if opt_out_refs else None
    f32 = jnp.float32
    cdt = wq_ref.dtype                     # MXU operand dtype (bf16 fast / f32 exact)

    layer = pl.program_id(1)
    first = layer == 0

    # Activation carry lives in the resident output block (its block index does not
    # depend on the layer axis, so it stays in VMEM across all layers of this tile).
    @pl.when(first)
    def _seed():
        out_ref[...] = q_ref[...]
    xq = out_ref[...]                                   # (Bb*S, E) f32
    xk = jnp.where(first, k_ref[...], xq)               # layer 0 may have k != q
    xv = jnp.where(first, v_ref[...], xq)

    # ---- in-projections: batch*seq folded into the MXU M dimension ----
    qp = jnp.dot(xq.astype(cdt), wq_ref[0], preferred_element_type=f32) + bq_ref[0]
    kp = jnp.dot(xk.astype(cdt), wk_ref[0], preferred_element_type=f32) + bk_ref[0]
    vp = jnp.dot(xv.astype(cdt), wv_ref[0], preferred_element_type=f32) + bv_ref[0]

    M, E = qp.shape
    Bb, S = block_b, seq
    hd = E // nhead
    qp = qp * (1.0 / math.sqrt(hd))          # fold softmax scale into q (f32)

    mask = mask_ref[...]                     # (Bb, 1, S) additive key-padding bias

    # ---- multi-head attention (batched over the batch tile per head) ----
    # TODO(synk): a single (Bb*nhead)-batched contraction needs a major-dim transpose
    # of the head axis which Mosaic does not lower robustly; per-head Bb-batched
    # contractions are used instead and the head merge is fused into the out-proj.
    wo = wo_ref[0]                           # (E, E), cdt
    x = jnp.zeros((M, E), f32)               # output-projection accumulator
    wsum = jnp.zeros((Bb, S, S), f32) if attnw_ref is not None else None
    for h in range(nhead):
        lo = h * hd
        qh = qp[:, lo:lo + hd].reshape(Bb, S, hd)
        kh = kp[:, lo:lo + hd].reshape(Bb, S, hd)
        vh = vp[:, lo:lo + hd].reshape(Bb, S, hd)
        sc = jnp.einsum('bqd,bkd->bqk', qh.astype(cdt), kh.astype(cdt),
                        preferred_element_type=f32) + mask
        sc = sc - jnp.max(sc, axis=-1, keepdims=True)
        p = jnp.exp(sc)
        p = p * pl.reciprocal(jnp.sum(p, axis=-1, keepdims=True), approx=True)
        if wsum is not None:
            wsum = wsum + p
        ctx = jnp.einsum('bqk,bkd->bqd', p.astype(cdt), vh.astype(cdt),
                         preferred_element_type=f32)          # (Bb, S, hd)
        # head merge folded into output projection: x += ctx_h @ Wo[h*hd:(h+1)*hd, :]
        x = x + jnp.dot(ctx.reshape(M, hd).astype(cdt), wo[lo:lo + hd, :],
                        preferred_element_type=f32)

    if attnw_ref is not None:
        # PyTorch need_weights=True, average_attn_weights=True
        attnw_ref[0] = wsum * (1.0 / nhead)

    x = x + bo_ref[0]

    # ---- residual strategy 1 + LayerNorm 1 (f32 elementwise) ----
    if res1 == 'sum':
        x = x + xq
    elif res1 == 'multiply':
        x = x * xq
    mu = jnp.mean(x, axis=-1, keepdims=True)
    var = jnp.mean((x - mu) ** 2, axis=-1, keepdims=True)
    x = (x - mu) * jax.lax.rsqrt(var + eps) * g1_ref[0] + be1_ref[0]

    # ---- feed-forward (dropout = identity in eval mode) ----
    # TODO(synk): train-mode dropout has no deterministic equivalent here.
    y = jnp.dot(x.astype(cdt), w1_ref[0], preferred_element_type=f32) + b1_ref[0]
    y = jnp.maximum(y, 0.0)
    y = jnp.dot(y.astype(cdt), w2_ref[0], preferred_element_type=f32) + b2_ref[0]

    if res2 == 'sum':
        y = y + x
    elif res2 == 'multiply':
        y = y * x
    mu2 = jnp.mean(y, axis=-1, keepdims=True)
    var2 = jnp.mean((y - mu2) ** 2, axis=-1, keepdims=True)
    out_ref[...] = (y - mu2) * jax.lax.rsqrt(var2 + eps) * g2_ref[0] + be2_ref[0]


# ----------------------------------------------------------------------------
# Wrapper: full encoder (all layers, all batch tiles) in ONE pallas_call.
# ----------------------------------------------------------------------------
def cross_attention_encoder(q, k, v, layer_params_list, *,
                            nhead,
                            src_key_padding_mask=None,
                            residual_strategy_1='none',
                            residual_strategy_2='none',
                            need_weights=True,
                            block_b=None,
                            mxu_dtype=jnp.bfloat16,
                            eps=1e-5):
    B, S, E = q.shape
    L = len(layer_params_list)
    FF = layer_params_list[0]['w1'].shape[-1]
    f32 = jnp.float32

    if block_b is None:
        block_b = min(B, 8)      # keep >=2 batch tiles when possible (v7x megacore)
    assert B % block_b == 0, "B must be a multiple of block_b"
    assert (block_b * S) % 8 == 0 or block_b == B, "batch tile must be sublane aligned"
    num_bt = B // block_b

    # key-padding mask -> additive bias (True = ignore).  Large finite negative
    # instead of -inf so fully-masked rows stay finite (uniform) rather than NaN.
    # TODO(synk): PyTorch propagates NaN for fully-masked key_padding rows.
    if src_key_padding_mask is None:
        mask_bias = jnp.zeros((B, 1, S), f32)
    elif src_key_padding_mask.dtype == jnp.bool_:
        mask_bias = jnp.where(src_key_padding_mask, -1e30, 0.0).astype(f32).reshape(B, 1, S)
    else:
        mask_bias = src_key_padding_mask.astype(f32).reshape(B, 1, S)

    # Stack per-layer parameters along a leading L axis (pipeline prefetches layer
    # l+1's weights during layer l's compute).  Matmul weights in mxu_dtype (bf16
    # halves weight DMA), everything elementwise-facing in f32.
    stack = lambda name, dt: jnp.stack([p[name] for p in layer_params_list], 0).astype(dt)
    wq, wk, wv, wo = (stack(n, mxu_dtype) for n in ('wq', 'wk', 'wv', 'wo'))
    w1, w2 = stack('w1', mxu_dtype), stack('w2', mxu_dtype)
    bq, bk, bv, bo = (stack(n, f32) for n in ('bq', 'bk', 'bv', 'bo'))
    b1, b2 = stack('b1', f32), stack('b2', f32)
    g1, be1, g2, be2 = (stack(n, f32) for n in ('g1', 'be1', 'g2', 'be2'))

    # Fold batch into the M dimension once, outside the kernel (free in XLA).
    q2 = q.reshape(B * S, E).astype(f32)
    k2 = k.reshape(B * S, E).astype(f32)
    v2 = v.reshape(B * S, E).astype(f32)

    act_spec = pl.BlockSpec((block_b * S, E), lambda bt, l: (bt, 0))
    per_layer = lambda shape: pl.BlockSpec((1,) + shape, lambda bt, l: (l, 0, 0))

    in_specs = [
        act_spec, act_spec, act_spec,
        pl.BlockSpec((block_b, 1, S), lambda bt, l: (bt, 0, 0)),
        per_layer((E, E)), per_layer((E, E)), per_layer((E, E)),       # Wq, Wk, Wv
        per_layer((1, E)), per_layer((1, E)), per_layer((1, E)),       # bq, bk, bv
        per_layer((E, E)), per_layer((1, E)),                          # Wo, bo
        per_layer((E, FF)), per_layer((1, FF)),                        # W1, b1
        per_layer((FF, E)), per_layer((1, E)),                         # W2, b2
        per_layer((1, E)), per_layer((1, E)),                          # gamma1, beta1
        per_layer((1, E)), per_layer((1, E)),                          # gamma2, beta2
    ]

    out_shapes = [jax.ShapeDtypeStruct((B * S, E), f32)]
    out_specs = [pl.BlockSpec((block_b * S, E), lambda bt, l: (bt, 0))]
    if need_weights:
        out_shapes.append(jax.ShapeDtypeStruct((L, B, S, S), f32))
        out_specs.append(pl.BlockSpec((1, block_b, S, S), lambda bt, l: (l, bt, 0, 0)))

    # Explicit VMEM budget (double-buffered blocks + headroom), clamped to a value
    # that is legal on v5e/v6e (128 MiB) and v7x (64 MiB).
    act_bytes = block_b * S * E * 4
    w_bytes = (4 * E * E + 2 * E * FF) * jnp.dtype(mxu_dtype).itemsize
    small_bytes = (8 * E + 2 * FF) * 4 + block_b * S * 4
    attnw_bytes = block_b * S * S * 4 if need_weights else 0
    per_step = 4 * act_bytes + w_bytes + small_bytes + attnw_bytes
    vmem_limit = int(min(max(3 * per_step + (4 << 20), 16 << 20), 48 << 20))

    kernel = functools.partial(
        _encoder_step_kernel, nhead=nhead,
        res1=residual_strategy_1, res2=residual_strategy_2,
        eps=eps, block_b=block_b, seq=S)

    results = pl.pallas_call(
        kernel,
        out_shape=tuple(out_shapes),
        grid=(num_bt, L),
        in_specs=in_specs,
        out_specs=tuple(out_specs),
        compiler_params=pltpu.CompilerParams(
            dimension_semantics=("parallel", "arbitrary"),
            vmem_limit_bytes=vmem_limit),
    )(q2, k2, v2, mask_bias,
      wq, wk, wv, bq, bk, bv, wo, bo, w1, b1, w2, b2, g1, be1, g2, be2)

    out = results[0].reshape(B, S, E)
    if need_weights:
        attnw = results[1]                       # (L, B, S, S)
        weights = [attnw[l] for l in range(L)]
    else:
        weights = None
    return out, weights


# ----------------------------------------------------------------------------
# Pure-JAX reference (correctness check of the kernel math).
# ----------------------------------------------------------------------------
def _encoder_ref(q, k, v, params_list, *, nhead, mask_bias, res1, res2, eps=1e-5):
    B, S, E = q.shape
    hd = E // nhead
    ln = lambda t, g, b: (t - t.mean(-1, keepdims=True)) / jnp.sqrt(
        ((t - t.mean(-1, keepdims=True)) ** 2).mean(-1, keepdims=True) + eps) * g + b
    weights = []
    out = q
    for p in params_list:
        qp = q @ p['wq'] + p['bq']
        kp = k @ p['wk'] + p['bk']
        vp = v @ p['wv'] + p['bv']
        rs = lambda t: t.reshape(B, S, nhead, hd).transpose(0, 2, 1, 3)
        qh, kh, vh = rs(qp), rs(kp), rs(vp)
        sc = jnp.einsum('bhqd,bhkd->bhqk', qh, kh) / math.sqrt(hd) \
            + mask_bias[:, None, :, :]
        pr = jax.nn.softmax(sc, axis=-1)
        att = jnp.einsum('bhqk,bhkd->bhqd', pr, vh).transpose(0, 2, 1, 3).reshape(B, S, E)
        x = att @ p['wo'] + p['bo']
        if res1 == 'sum':
            x = x + q
        elif res1 == 'multiply':
            x = x * q
        x = ln(x, p['g1'], p['be1'])
        y = jnp.maximum(x @ p['w1'] + p['b1'], 0.0) @ p['w2'] + p['b2']
        if res2 == 'sum':
            y = y + x
        elif res2 == 'multiply':
            y = y * x
        out = ln(y, p['g2'], p['be2'])
        q = k = v = out
        weights.append(pr.mean(axis=1))
    return out, weights


# ----------------------------------------------------------------------------
# Deterministic synthetic parameter init (shapes from the module __init__).
# ----------------------------------------------------------------------------
def init_layer_params(key, d_model, dim_ff):
    ks = jax.random.split(key, 6)
    sc = 1.0 / math.sqrt(d_model)
    return {
        'wq': jax.random.normal(ks[0], (d_model, d_model), jnp.float32) * sc,
        'wk': jax.random.normal(ks[1], (d_model, d_model), jnp.float32) * sc,
        'wv': jax.random.normal(ks[2], (d_model, d_model), jnp.float32) * sc,
        'wo': jax.random.normal(ks[3], (d_model, d_model), jnp.float32) * sc,
        'w1': jax.random.normal(ks[4], (d_model, dim_ff), jnp.float32) * sc,
        'w2': jax.random.normal(ks[5], (dim_ff, d_model), jnp.float32) / math.sqrt(dim_ff),
        'bq': jnp.zeros((1, d_model), jnp.float32),
        'bk': jnp.zeros((1, d_model), jnp.float32),
        'bv': jnp.zeros((1, d_model), jnp.float32),
        'bo': jnp.zeros((1, d_model), jnp.float32),
        'b1': jnp.zeros((1, dim_ff), jnp.float32),
        'b2': jnp.zeros((1, d_model), jnp.float32),
        'g1': jnp.ones((1, d_model), jnp.float32),
        'be1': jnp.zeros((1, d_model), jnp.float32),
        'g2': jnp.ones((1, d_model), jnp.float32),
        'be2': jnp.zeros((1, d_model), jnp.float32),
    }


if __name__ == "__main__":
    B, S, E = 4, 8, 32           # batch, seq, d_model
    NHEAD, FF = 4, 64            # heads, feed-forward dim
    NUM_LAYERS = 2

    key = jax.random.PRNGKey(0)
    kq, kk, kv, kp = jax.random.split(key, 4)
    q = jax.random.normal(kq, (B, S, E), jnp.float32)
    k = jax.random.normal(kk, (B, S, E), jnp.float32)
    v = jax.random.normal(kv, (B, S, E), jnp.float32)
    # boolean key-padding mask: pad the last two key positions of odd batch rows
    pad = jnp.zeros((B, S), jnp.bool_).at[1::2, -2:].set(True)
    mask_bias = jnp.where(pad, -1e30, 0.0).astype(jnp.float32).reshape(B, 1, S)

    # _get_clones deep-copies one initialized layer -> identical params per layer.
    base_params = init_layer_params(kp, E, FF)
    layer_params = [base_params for _ in range(NUM_LAYERS)]

    # --- exact path (f32 MXU): tight check of the kernel math ---
    out32, w32 = cross_attention_encoder(
        q, k, v, layer_params, nhead=NHEAD, src_key_padding_mask=pad,
        residual_strategy_1='none', residual_strategy_2='none',
        mxu_dtype=jnp.float32, block_b=2)
    out32 = jax.block_until_ready(out32)
    ref_out, ref_w = _encoder_ref(q, k, v, layer_params, nhead=NHEAD,
                                  mask_bias=mask_bias, res1='none', res2='none')
    assert out32.shape == (B, S, E) and len(w32) == NUM_LAYERS
    assert w32[0].shape == (B, S, S)
    assert jnp.allclose(out32, ref_out, rtol=5e-3, atol=5e-3)
    assert jnp.allclose(w32[-1], ref_w[-1], rtol=5e-3, atol=5e-3)

    # --- fast path (bf16 MXU operands) with residual strategies ---
    out_bf, w_bf = cross_attention_encoder(
        q, k, v, layer_params, nhead=NHEAD, src_key_padding_mask=pad,
        residual_strategy_1='sum', residual_strategy_2='sum',
        mxu_dtype=jnp.bfloat16, block_b=2)
    out_bf = jax.block_until_ready(out_bf)
    ref_out2, ref_w2 = _encoder_ref(q, k, v, layer_params, nhead=NHEAD,
                                    mask_bias=mask_bias, res1='sum', res2='sum')
    assert jnp.allclose(out_bf, ref_out2, rtol=5e-2, atol=5e-2)
    assert jnp.allclose(w_bf[-1], ref_w2[-1], rtol=5e-2, atol=5e-2)

    # --- weights-free fast path (drops the (L,B,S,S) output + its VMEM block) ---
    out_nw, w_nw = cross_attention_encoder(
        q, k, v, layer_params, nhead=NHEAD, src_key_padding_mask=pad,
        residual_strategy_1='sum', residual_strategy_2='sum',
        mxu_dtype=jnp.bfloat16, block_b=2, need_weights=False)
    out_nw = jax.block_until_ready(out_nw)
    assert w_nw is None
    assert jnp.allclose(out_nw, out_bf, rtol=1e-5, atol=1e-5)

    print("KERNEL_OK")
</pallas_src>

<mosaic_0001>
module attributes {stable_mosaic.version = 11 : i64} {
  func.func @_encoder_step_kernel(%arg0: i32, %arg1: i32, %arg2: memref<16x32xf32, #tpu.memory_space<vmem>>, %arg3: memref<16x32xf32, #tpu.memory_space<vmem>>, %arg4: memref<16x32xf32, #tpu.memory_space<vmem>>, %arg5: memref<2x1x8xf32, #tpu.memory_space<vmem>>, %arg6: memref<1x32x32xf32, #tpu.memory_space<vmem>>, %arg7: memref<1x32x32xf32, #tpu.memory_space<vmem>>, %arg8: memref<1x32x32xf32, #tpu.memory_space<vmem>>, %arg9: memref<1x1x32xf32, #tpu.memory_space<vmem>>, %arg10: memref<1x1x32xf32, #tpu.memory_space<vmem>>, %arg11: memref<1x1x32xf32, #tpu.memory_space<vmem>>, %arg12: memref<1x32x32xf32, #tpu.memory_space<vmem>>, %arg13: memref<1x1x32xf32, #tpu.memory_space<vmem>>, %arg14: memref<1x32x64xf32, #tpu.memory_space<vmem>>, %arg15: memref<1x1x64xf32, #tpu.memory_space<vmem>>, %arg16: memref<1x64x32xf32, #tpu.memory_space<vmem>>, %arg17: memref<1x1x32xf32, #tpu.memory_space<vmem>>, %arg18: memref<1x1x32xf32, #tpu.memory_space<vmem>>, %arg19: memref<1x1x32xf32, #tpu.memory_space<vmem>>, %arg20: memref<1x1x32xf32, #tpu.memory_space<vmem>>, %arg21: memref<1x1x32xf32, #tpu.memory_space<vmem>>, %arg22: memref<16x32xf32, #tpu.memory_space<vmem>>, %arg23: memref<1x2x8x8xf32, #tpu.memory_space<vmem>>) attributes {dimension_semantics = [#tpu.dimension_semantics<parallel>, #tpu.dimension_semantics<arbitrary>], iteration_bounds = array<i64: 2, 2>, scalar_prefetch = 0 : i64, scratch_operands = 0 : i64, tpu.core_type = #tpu.core_type<tc>, window_params = [{transform_indices = @transform_0, window_bounds = array<i64: 16, 32>}, {transform_indices = @transform_1, window_bounds = array<i64: 16, 32>}, {transform_indices = @transform_2, window_bounds = array<i64: 16, 32>}, {transform_indices = @transform_3, window_bounds = array<i64: 2, 1, 8>}, {transform_indices = @transform_4, window_bounds = array<i64: 1, 32, 32>}, {transform_indices = @transform_5, window_bounds = array<i64: 1, 32, 32>}, {transform_indices = @transform_6, window_bounds = array<i64: 1, 32, 32>}, {transform_indices = @transform_7, window_bounds = array<i64: 1, 1, 32>}, {transform_indices = @transform_8, window_bounds = array<i64: 1, 1, 32>}, {transform_indices = @transform_9, window_bounds = array<i64: 1, 1, 32>}, {transform_indices = @transform_10, window_bounds = array<i64: 1, 32, 32>}, {transform_indices = @transform_11, window_bounds = array<i64: 1, 1, 32>}, {transform_indices = @transform_12, window_bounds = array<i64: 1, 32, 64>}, {transform_indices = @transform_13, window_bounds = array<i64: 1, 1, 64>}, {transform_indices = @transform_14, window_bounds = array<i64: 1, 64, 32>}, {transform_indices = @transform_15, window_bounds = array<i64: 1, 1, 32>}, {transform_indices = @transform_16, window_bounds = array<i64: 1, 1, 32>}, {transform_indices = @transform_17, window_bounds = array<i64: 1, 1, 32>}, {transform_indices = @transform_18, window_bounds = array<i64: 1, 1, 32>}, {transform_indices = @transform_19, window_bounds = array<i64: 1, 1, 32>}, {transform_indices = @transform_20, window_bounds = array<i64: 16, 32>}, {transform_indices = @transform_21, window_bounds = array<i64: 1, 2, 8, 8>}]} {
    %c0_i32 = arith.constant 0 : i32
    %0 = arith.cmpi eq, %arg1, %c0_i32 : i32
    %1 = arith.extui %0 : i1 to i32
    %c0_i32_0 = arith.constant 0 : i32
    %2 = arith.cmpi ne, %1, %c0_i32_0 : i32
    scf.if %2 {
      %c0_102 = arith.constant 0 : index
      %c0_103 = arith.constant 0 : index
      %214 = vector.load %arg2[%c0_102, %c0_103] : memref<16x32xf32, #tpu.memory_space<vmem>>, vector<16x32xf32>
      %c0_104 = arith.constant 0 : index
      %c0_105 = arith.constant 0 : index
      %215 = vector.load %arg22[%c0_104, %c0_105] : memref<16x32xf32, #tpu.memory_space<vmem>>, vector<16x32xf32>
      tpu.vector_store %arg22[%c0_104, %c0_105], %214 {strides = array<i32>} : memref<16x32xf32, #tpu.memory_space<vmem>>, vector<16x32xf32>,
    } else {
    }
    %c0 = arith.constant 0 : index
    %c0_1 = arith.constant 0 : index
    %3 = vector.load %arg22[%c0, %c0_1] : memref<16x32xf32, #tpu.memory_space<vmem>>, vector<16x32xf32>
    %c0_2 = arith.constant 0 : index
    %c0_3 = arith.constant 0 : index
    %4 = vector.load %arg3[%c0_2, %c0_3] : memref<16x32xf32, #tpu.memory_space<vmem>>, vector<16x32xf32>
    %5 = arith.select %0, %4, %3 : vector<16x32xf32>
    %c0_4 = arith.constant 0 : index
    %c0_5 = arith.constant 0 : index
    %6 = vector.load %arg4[%c0_4, %c0_5] : memref<16x32xf32, #tpu.memory_space<vmem>>, vector<16x32xf32>
    %7 = arith.select %0, %6, %3 : vector<16x32xf32>
    %c0_6 = arith.constant 0 : index
    %c0_7 = arith.constant 0 : index
    %c0_8 = arith.constant 0 : index
    %8 = vector.load %arg6[%c0_6, %c0_7, %c0_8] : memref<1x32x32xf32, #tpu.memory_space<vmem>>, vector<1x32x32xf32>
    %9 = vector.shape_cast %8 : vector<1x32x32xf32> to vector<32x32xf32>
    %cst = arith.constant dense<0.000000e+00> : vector<16x32xf32>
    %10 = tpu.matmul %3, %9, %cst {dimension_numbers = #tpu.dot_dimension_numbers<[1], [0], [0], [1], [0, 0, 1, 1], [], []>} : vector<16x32xf32>, vector<32x32xf32>, vector<16x32xf32> -> vector<16x32xf32>
    %c0_9 = arith.constant 0 : index
    %c0_10 = arith.constant 0 : index
    %c0_11 = arith.constant 0 : index
    %11 = vector.load %arg9[%c0_9, %c0_10, %c0_11] : memref<1x1x32xf32, #tpu.memory_space<vmem>>, vector<1x1x32xf32>
    %12 = vector.shape_cast %11 : vector<1x1x32xf32> to vector<1x32xf32>
    %13 = vector.broadcast %12 : vector<1x32xf32> to vector<16x32xf32>
    %14 = arith.addf %10, %13 : vector<16x32xf32>
    %c0_12 = arith.constant 0 : index
    %c0_13 = arith.constant 0 : index
    %c0_14 = arith.constant 0 : index
    %15 = vector.load %arg7[%c0_12, %c0_13, %c0_14] : memref<1x32x32xf32, #tpu.memory_space<vmem>>, vector<1x32x32xf32>
    %16 = vector.shape_cast %15 : vector<1x32x32xf32> to vector<32x32xf32>
    %cst_15 = arith.constant dense<0.000000e+00> : vector<16x32xf32>
    %17 = tpu.matmul %5, %16, %cst_15 {dimension_numbers = #tpu.dot_dimension_numbers<[1], [0], [0], [1], [0, 0, 1, 1], [], []>} : vector<16x32xf32>, vector<32x32xf32>, vector<16x32xf32> -> vector<16x32xf32>
    %c0_16 = arith.constant 0 : index
    %c0_17 = arith.constant 0 : index
    %c0_18 = arith.constant 0 : index
    %18 = vector.load %arg10[%c0_16, %c0_17, %c0_18] : memref<1x1x32xf32, #tpu.memory_space<vmem>>, vector<1x1x32xf32>
    %19 = vector.shape_cast %18 : vector<1x1x32xf32> to vector<1x32xf32>
    %20 = vector.broadcast %19 : vector<1x32xf32> to vector<16x32xf32>
    %21 = arith.addf %17, %20 : vector<16x32xf32>
    %c0_19 = arith.constant 0 : index
    %c0_20 = arith.constant 0 : index
    %c0_21 = arith.constant 0 : index
    %22 = vector.load %arg8[%c0_19, %c0_20, %c0_21] : memref<1x32x32xf32, #tpu.memory_space<vmem>>, vector<1x32x32xf32>
    %23 = vector.shape_cast %22 : vector<1x32x32xf32> to vector<32x32xf32>
    %cst_22 = arith.constant dense<0.000000e+00> : vector<16x32xf32>
    %24 = tpu.matmul %7, %23, %cst_22 {dimension_numbers = #tpu.dot_dimension_numbers<[1], [0], [0], [1], [0, 0, 1, 1], [], []>} : vector<16x32xf32>, vector<32x32xf32>, vector<16x32xf32> -> vector<16x32xf32>
    %c0_23 = arith.constant 0 : index
    %c0_24 = arith.constant 0 : index
    %c0_25 = arith.constant 0 : index
    %25 = vector.load %arg11[%c0_23, %c0_24, %c0_25] : memref<1x1x32xf32, #tpu.memory_space<vmem>>, vector<1x1x32xf32>
    %26 = vector.shape_cast %25 : vector<1x1x32xf32> to vector<1x32xf32>
    %27 = vector.broadcast %26 : vector<1x32xf32> to vector<16x32xf32>
    %28 = arith.addf %24, %27 : vector<16x32xf32>
    %cst_26 = arith.constant 0.353553385 : f32
    %29 = vector.broadcast %cst_26 : f32 to vector<16x32xf32>
    %30 = arith.mulf %14, %29 : vector<16x32xf32>
    %c0_27 = arith.constant 0 : index
    %c0_28 = arith.constant 0 : index
    %c0_29 = arith.constant 0 : index
    %31 = vector.load %arg5[%c0_27, %c0_28, %c0_29] : memref<2x1x8xf32, #tpu.memory_space<vmem>>, vector<2x1x8xf32>
    %c0_30 = arith.constant 0 : index
    %c0_31 = arith.constant 0 : index
    %c0_32 = arith.constant 0 : index
    %32 = vector.load %arg12[%c0_30, %c0_31, %c0_32] : memref<1x32x32xf32, #tpu.memory_space<vmem>>, vector<1x32x32xf32>
    %33 = vector.shape_cast %32 : vector<1x32x32xf32> to vector<32x32xf32>
    %cst_33 = arith.constant 0.000000e+00 : f32
    %34 = vector.broadcast %cst_33 : f32 to vector<16x32xf32>
    %cst_34 = arith.constant 0.000000e+00 : f32
    %35 = vector.broadcast %cst_34 : f32 to vector<2x8x8xf32>
    %36 = vector.extract_strided_slice %30 {offsets = [0, 0], sizes = [16, 8], strides = [1, 1]} : vector<16x32xf32> to vector<16x8xf32>
    %37 = vector.shape_cast %36 : vector<16x8xf32> to vector<2x8x8xf32>
    %38 = vector.extract_strided_slice %21 {offsets = [0, 0], sizes = [16, 8], strides = [1, 1]} : vector<16x32xf32> to vector<16x8xf32>
    %39 = vector.shape_cast %38 : vector<16x8xf32> to vector<2x8x8xf32>
    %40 = vector.extract_strided_slice %28 {offsets = [0, 0], sizes = [16, 8], strides = [1, 1]} : vector<16x32xf32> to vector<16x8xf32>
    %41 = vector.shape_cast %40 : vector<16x8xf32> to vector<2x8x8xf32>
    "tpu.trace_start"() <{level = 10 : i32, message = "bqd,bkd->bqk"}> : () -> ()
    %cst_35 = arith.constant dense<0.000000e+00> : vector<2x8x8xf32>
    %42 = tpu.matmul %37, %39, %cst_35 {dimension_numbers = #tpu.dot_dimension_numbers<[2], [2], [1], [1], [0, 0, 0, 1, 1, 1], [0], [0]>} : vector<2x8x8xf32>, vector<2x8x8xf32>, vector<2x8x8xf32> -> vector<2x8x8xf32>
    "tpu.trace_stop"() : () -> ()
    %43 = vector.broadcast %31 : vector<2x1x8xf32> to vector<2x8x8xf32>
    %44 = arith.addf %42, %43 : vector<2x8x8xf32>
    %cst_36 = arith.constant dense<0xFF800000> : vector<2x8xf32>
    %45 = vector.multi_reduction <maximumf>, %44, %cst_36 [2] : vector<2x8x8xf32> to vector<2x8xf32>
    %46 = vector.shape_cast %45 : vector<2x8xf32> to vector<2x8x1xf32>
    %47 = vector.broadcast %46 : vector<2x8x1xf32> to vector<2x8x8xf32>
    %48 = arith.subf %44, %47 : vector<2x8x8xf32>
    %49 = math.exp %48 : vector<2x8x8xf32>
    %cst_37 = arith.constant dense<0.000000e+00> : vector<2x8xf32>
    %50 = vector.multi_reduction <add>, %49, %cst_37 [2] : vector<2x8x8xf32> to vector<2x8xf32>
    %51 = vector.shape_cast %50 : vector<2x8xf32> to vector<2x8x1xf32>
    %52 = tpu.reciprocal %51 {approx = true} : vector<2x8x1xf32> -> vector<2x8x1xf32>
    %53 = vector.broadcast %52 : vector<2x8x1xf32> to vector<2x8x8xf32>
    %54 = arith.mulf %49, %53 : vector<2x8x8xf32>
    %55 = arith.addf %35, %54 : vector<2x8x8xf32>
    "tpu.trace_start"() <{level = 10 : i32, message = "bqk,bkd->bqd"}> : () -> ()
    %cst_38 = arith.constant dense<0.000000e+00> : vector<2x8x8xf32>
    %56 = tpu.matmul %54, %41, %cst_38 {dimension_numbers = #tpu.dot_dimension_numbers<[2], [1], [1], [2], [0, 0, 0, 1, 1, 2], [0], [0]>} : vector<2x8x8xf32>, vector<2x8x8xf32>, vector<2x8x8xf32> -> vector<2x8x8xf32>
    "tpu.trace_stop"() : () -> ()
    %57 = vector.shape_cast %56 : vector<2x8x8xf32> to vector<16x8xf32>
    %58 = vector.extract_strided_slice %33 {offsets = [0, 0], sizes = [8, 32], strides = [1, 1]} : vector<32x32xf32> to vector<8x32xf32>
    %cst_39 = arith.constant dense<0.000000e+00> : vector<16x32xf32>
    %59 = tpu.matmul %57, %58, %cst_39 {dimension_numbers = #tpu.dot_dimension_numbers<[1], [0], [0], [1], [0, 0, 1, 1], [], []>} : vector<16x8xf32>, vector<8x32xf32>, vector<16x32xf32> -> vector<16x32xf32>
    %60 = arith.addf %34, %59 : vector<16x32xf32>
    %61 = vector.extract_strided_slice %30 {offsets = [0, 8], sizes = [16, 8], strides = [1, 1]} : vector<16x32xf32> to vector<16x8xf32>
    %62 = vector.shape_cast %61 : vector<16x8xf32> to vector<2x8x8xf32>
    %63 = vector.extract_strided_slice %21 {offsets = [0, 8], sizes = [16, 8], strides = [1, 1]} : vector<16x32xf32> to vector<16x8xf32>
    %64 = vector.shape_cast %63 : vector<16x8xf32> to vector<2x8x8xf32>
    %65 = vector.extract_strided_slice %28 {offsets = [0, 8], sizes = [16, 8], strides = [1, 1]} : vector<16x32xf32> to vector<16x8xf32>
    %66 = vector.shape_cast %65 : vector<16x8xf32> to vector<2x8x8xf32>
    "tpu.trace_start"() <{level = 10 : i32, message = "bqd,bkd->bqk"}> : () -> ()
    %cst_40 = arith.constant dense<0.000000e+00> : vector<2x8x8xf32>
    %67 = tpu.matmul %62, %64, %cst_40 {dimension_numbers = #tpu.dot_dimension_numbers<[2], [2], [1], [1], [0, 0, 0, 1, 1, 1], [0], [0]>} : vector<2x8x8xf32>, vector<2x8x8xf32>, vector<2x8x8xf32> -> vector<2x8x8xf32>
    "tpu.trace_stop"() : () -> ()
    %68 = vector.broadcast %31 : vector<2x1x8xf32> to vector<2x8x8xf32>
    %69 = arith.addf %67, %68 : vector<2x8x8xf32>
    %cst_41 = arith.constant dense<0xFF800000> : vector<2x8xf32>
    %70 = vector.multi_reduction <maximumf>, %69, %cst_41 [2] : vector<2x8x8xf32> to vector<2x8xf32>
    %71 = vector.shape_cast %70 : vector<2x8xf32> to vector<2x8x1xf32>
    %72 = vector.broadcast %71 : vector<2x8x1xf32> to vector<2x8x8xf32>
    %73 = arith.subf %69, %72 : vector<2x8x8xf32>
    %74 = math.exp %73 : vector<2x8x8xf32>
    %cst_42 = arith.constant dense<0.000000e+00> : vector<2x8xf32>
    %75 = vector.multi_reduction <add>, %74, %cst_42 [2] : vector<2x8x8xf32> to vector<2x8xf32>
    %76 = vector.shape_cast %75 : vector<2x8xf32> to vector<2x8x1xf32>
    %77 = tpu.reciprocal %76 {approx = true} : vector<2x8x1xf32> -> vector<2x8x1xf32>
    %78 = vector.broadcast %77 : vector<2x8x1xf32> to vector<2x8x8xf32>
    %79 = arith.mulf %74, %78 : vector<2x8x8xf32>
    %80 = arith.addf %55, %79 : vector<2x8x8xf32>
    "tpu.trace_start"() <{level = 10 : i32, message = "bqk,bkd->bqd"}> : () -> ()
    %cst_43 = arith.constant dense<0.000000e+00> : vector<2x8x8xf32>
    %81 = tpu.matmul %79, %66, %cst_43 {dimension_numbers = #tpu.dot_dimension_numbers<[2], [1], [1], [2], [0, 0, 0, 1, 1, 2], [0], [0]>} : vector<2x8x8xf32>, vector<2x8x8xf32>, vector<2x8x8xf32> -> vector<2x8x8xf32>
    "tpu.trace_stop"() : () -> ()
    %82 = vector.shape_cast %81 : vector<2x8x8xf32> to vector<16x8xf32>
    %83 = vector.extract_strided_slice %33 {offsets = [8, 0], sizes = [8, 32], strides = [1, 1]} : vector<32x32xf32> to vector<8x32xf32>
    %cst_44 = arith.constant dense<0.000000e+00> : vector<16x32xf32>
    %84 = tpu.matmul %82, %83, %cst_44 {dimension_numbers = #tpu.dot_dimension_numbers<[1], [0], [0], [1], [0, 0, 1, 1], [], []>} : vector<16x8xf32>, vector<8x32xf32>, vector<16x32xf32> -> vector<16x32xf32>
    %85 = arith.addf %60, %84 : vector<16x32xf32>
    %86 = vector.extract_strided_slice %30 {offsets = [0, 16], sizes = [16, 8], strides = [1, 1]} : vector<16x32xf32> to vector<16x8xf32>
    %87 = vector.shape_cast %86 : vector<16x8xf32> to vector<2x8x8xf32>
    %88 = vector.extract_strided_slice %21 {offsets = [0, 16], sizes = [16, 8], strides = [1, 1]} : vector<16x32xf32> to vector<16x8xf32>
    %89 = vector.shape_cast %88 : vector<16x8xf32> to vector<2x8x8xf32>
    %90 = vector.extract_strided_slice %28 {offsets = [0, 16], sizes = [16, 8], strides = [1, 1]} : vector<16x32xf32> to vector<16x8xf32>
    %91 = vector.shape_cast %90 : vector<16x8xf32> to vector<2x8x8xf32>
    "tpu.trace_start"() <{level = 10 : i32, message = "bqd,bkd->bqk"}> : () -> ()
    %cst_45 = arith.constant dense<0.000000e+00> : vector<2x8x8xf32>
    %92 = tpu.matmul %87, %89, %cst_45 {dimension_numbers = #tpu.dot_dimension_numbers<[2], [2], [1], [1], [0, 0, 0, 1, 1, 1], [0], [0]>} : vector<2x8x8xf32>, vector<2x8x8xf32>, vector<2x8x8xf32> -> vector<2x8x8xf32>
    "tpu.trace_stop"() : () -> ()
    %93 = vector.broadcast %31 : vector<2x1x8xf32> to vector<2x8x8xf32>
    %94 = arith.addf %92, %93 : vector<2x8x8xf32>
    %cst_46 = arith.constant dense<0xFF800000> : vector<2x8xf32>
    %95 = vector.multi_reduction <maximumf>, %94, %cst_46 [2] : vector<2x8x8xf32> to vector<2x8xf32>
    %96 = vector.shape_cast %95 : vector<2x8xf32> to vector<2x8x1xf32>
    %97 = vector.broadcast %96 : vector<2x8x1xf32> to vector<2x8x8xf32>
    %98 = arith.subf %94, %97 : vector<2x8x8xf32>
    %99 = math.exp %98 : vector<2x8x8xf32>
    %cst_47 = arith.constant dense<0.000000e+00> : vector<2x8xf32>
    %100 = vector.multi_reduction <add>, %99, %cst_47 [2] : vector<2x8x8xf32> to vector<2x8xf32>
    %101 = vector.shape_cast %100 : vector<2x8xf32> to vector<2x8x1xf32>
    %102 = tpu.reciprocal %101 {approx = true} : vector<2x8x1xf32> -> vector<2x8x1xf32>
    %103 = vector.broadcast %102 : vector<2x8x1xf32> to vector<2x8x8xf32>
    %104 = arith.mulf %99, %103 : vector<2x8x8xf32>
    %105 = arith.addf %80, %104 : vector<2x8x8xf32>
    "tpu.trace_start"() <{level = 10 : i32, message = "bqk,bkd->bqd"}> : () -> ()
    %cst_48 = arith.constant dense<0.000000e+00> : vector<2x8x8xf32>
    %106 = tpu.matmul %104, %91, %cst_48 {dimension_numbers = #tpu.dot_dimension_numbers<[2], [1], [1], [2], [0, 0, 0, 1, 1, 2], [0], [0]>} : vector<2x8x8xf32>, vector<2x8x8xf32>, vector<2x8x8xf32> -> vector<2x8x8xf32>
    "tpu.trace_stop"() : () -> ()
    %107 = vector.shape_cast %106 : vector<2x8x8xf32> to vector<16x8xf32>
    %108 = vector.extract_strided_slice %33 {offsets = [16, 0], sizes = [8, 32], strides = [1, 1]} : vector<32x32xf32> to vector<8x32xf32>
    %cst_49 = arith.constant dense<0.000000e+00> : vector<16x32xf32>
    %109 = tpu.matmul %107, %108, %cst_49 {dimension_numbers = #tpu.dot_dimension_numbers<[1], [0], [0], [1], [0, 0, 1, 1], [], []>} : vector<16x8xf32>, vector<8x32xf32>, vector<16x32xf32> -> vector<16x32xf32>
    %110 = arith.addf %85, %109 : vector<16x32xf32>
    %111 = vector.extract_strided_slice %30 {offsets = [0, 24], sizes = [16, 8], strides = [1, 1]} : vector<16x32xf32> to vector<16x8xf32>
    %112 = vector.shape_cast %111 : vector<16x8xf32> to vector<2x8x8xf32>
    %113 = vector.extract_strided_slice %21 {offsets = [0, 24], sizes = [16, 8], strides = [1, 1]} : vector<16x32xf32> to vector<16x8xf32>
    %114 = vector.shape_cast %113 : vector<16x8xf32> to vector<2x8x8xf32>
    %115 = vector.extract_strided_slice %28 {offsets = [0, 24], sizes = [16, 8], strides = [1, 1]} : vector<16x32xf32> to vector<16x8xf32>
    %116 = vector.shape_cast %115 : vector<16x8xf32> to vector<2x8x8xf32>
    "tpu.trace_start"() <{level = 10 : i32, message = "bqd,bkd->bqk"}> : () -> ()
    %cst_50 = arith.constant dense<0.000000e+00> : vector<2x8x8xf32>
    %117 = tpu.matmul %112, %114, %cst_50 {dimension_numbers = #tpu.dot_dimension_numbers<[2], [2], [1], [1], [0, 0, 0, 1, 1, 1], [0], [0]>} : vector<2x8x8xf32>, vector<2x8x8xf32>, vector<2x8x8xf32> -> vector<2x8x8xf32>
    "tpu.trace_stop"() : () -> ()
    %118 = vector.broadcast %31 : vector<2x1x8xf32> to vector<2x8x8xf32>
    %119 = arith.addf %117, %118 : vector<2x8x8xf32>
    %cst_51 = arith.constant dense<0xFF800000> : vector<2x8xf32>
    %120 = vector.multi_reduction <maximumf>, %119, %cst_51 [2] : vector<2x8x8xf32> to vector<2x8xf32>
    %121 = vector.shape_cast %120 : vector<2x8xf32> to vector<2x8x1xf32>
    %122 = vector.broadcast %121 : vector<2x8x1xf32> to vector<2x8x8xf32>
    %123 = arith.subf %119, %122 : vector<2x8x8xf32>
    %124 = math.exp %123 : vector<2x8x8xf32>
    %cst_52 = arith.constant dense<0.000000e+00> : vector<2x8xf32>
    %125 = vector.multi_reduction <add>, %124, %cst_52 [2] : vector<2x8x8xf32> to vector<2x8xf32>
    %126 = vector.shape_cast %125 : vector<2x8xf32> to vector<2x8x1xf32>
    %127 = tpu.reciprocal %126 {approx = true} : vector<2x8x1xf32> -> vector<2x8x1xf32>
    %128 = vector.broadcast %127 : vector<2x8x1xf32> to vector<2x8x8xf32>
    %129 = arith.mulf %124, %128 : vector<2x8x8xf32>
    %130 = arith.addf %105, %129 : vector<2x8x8xf32>
    "tpu.trace_start"() <{level = 10 : i32, message = "bqk,bkd->bqd"}> : () -> ()
    %cst_53 = arith.constant dense<0.000000e+00> : vector<2x8x8xf32>
    %131 = tpu.matmul %129, %116, %cst_53 {dimension_numbers = #tpu.dot_dimension_numbers<[2], [1], [1], [2], [0, 0, 0, 1, 1, 2], [0], [0]>} : vector<2x8x8xf32>, vector<2x8x8xf32>, vector<2x8x8xf32> -> vector<2x8x8xf32>
    "tpu.trace_stop"() : () -> ()
    %132 = vector.shape_cast %131 : vector<2x8x8xf32> to vector<16x8xf32>
    %133 = vector.extract_strided_slice %33 {offsets = [24, 0], sizes = [8, 32], strides = [1, 1]} : vector<32x32xf32> to vector<8x32xf32>
    %cst_54 = arith.constant dense<0.000000e+00> : vector<16x32xf32>
    %134 = tpu.matmul %132, %133, %cst_54 {dimension_numbers = #tpu.dot_dimension_numbers<[1], [0], [0], [1], [0, 0, 1, 1], [], []>} : vector<16x8xf32>, vector<8x32xf32>, vector<16x32xf32> -> vector<16x32xf32>
    %135 = arith.addf %110, %134 : vector<16x32xf32>
    %cst_55 = arith.constant 2.500000e-01 : f32
    %136 = vector.broadcast %cst_55 : f32 to vector<2x8x8xf32>
    %137 = arith.mulf %130, %136 : vector<2x8x8xf32>
    %c0_56 = arith.constant 0 : index
    %c0_57 = arith.constant 0 : index
    %c0_58 = arith.constant 0 : index
    %c0_59 = arith.constant 0 : index
    %138 = vector.load %arg23[%c0_56, %c0_57, %c0_58, %c0_59] : memref<1x2x8x8xf32, #tpu.memory_space<vmem>>, vector<1x2x8x8xf32>
    %139 = vector.shape_cast %138 : vector<1x2x8x8xf32> to vector<2x8x8xf32>
    %140 = vector.shape_cast %137 : vector<2x8x8xf32> to vector<1x2x8x8xf32>
    tpu.vector_store %arg23[%c0_56, %c0_57, %c0_58, %c0_59], %140 {strides = array<i32>} : memref<1x2x8x8xf32, #tpu.memory_space<vmem>>, vector<1x2x8x8xf32>,
    %c0_60 = arith.constant 0 : index
    %c0_61 = arith.constant 0 : index
    %c0_62 = arith.constant 0 : index
    %141 = vector.load %arg13[%c0_60, %c0_61, %c0_62] : memref<1x1x32xf32, #tpu.memory_space<vmem>>, vector<1x1x32xf32>
    %142 = vector.shape_cast %141 : vector<1x1x32xf32> to vector<1x32xf32>
    %143 = vector.broadcast %142 : vector<1x32xf32> to vector<16x32xf32>
    %144 = arith.addf %135, %143 : vector<16x32xf32>
    %cst_63 = arith.constant dense<0.000000e+00> : vector<16xf32>
    %145 = vector.multi_reduction <add>, %144, %cst_63 [1] : vector<16x32xf32> to vector<16xf32>
    %146 = vector.shape_cast %145 : vector<16xf32> to vector<16x1xf32>
    %cst_64 = arith.constant 3.200000e+01 : f32
    %147 = vector.broadcast %cst_64 : f32 to vector<16x1xf32>
    %148 = arith.divf %146, %147 : vector<16x1xf32>
    %149 = vector.broadcast %148 : vector<16x1xf32> to vector<16x32xf32>
    %150 = arith.subf %144, %149 : vector<16x32xf32>
    %151 = arith.mulf %150, %150 : vector<16x32xf32>
    %cst_65 = arith.constant dense<0.000000e+00> : vector<16xf32>
    %152 = vector.multi_reduction <add>, %151, %cst_65 [1] : vector<16x32xf32> to vector<16xf32>
    %153 = vector.shape_cast %152 : vector<16xf32> to vector<16x1xf32>
    %cst_66 = arith.constant 3.200000e+01 : f32
    %154 = vector.broadcast %cst_66 : f32 to vector<16x1xf32>
    %155 = arith.divf %153, %154 : vector<16x1xf32>
    %156 = vector.broadcast %148 : vector<16x1xf32> to vector<16x32xf32>
    %157 = arith.subf %144, %156 : vector<16x32xf32>
    %cst_67 = arith.constant 9.99999974E-6 : f32
    %158 = vector.broadcast %cst_67 : f32 to vector<16x1xf32>
    %159 = arith.addf %155, %158 : vector<16x1xf32>
    %160 = math.rsqrt %159 : vector<16x1xf32>
    %161 = vector.broadcast %160 : vector<16x1xf32> to vector<16x32xf32>
    %162 = arith.mulf %157, %161 : vector<16x32xf32>
    %c0_68 = arith.constant 0 : index
    %c0_69 = arith.constant 0 : index
    %c0_70 = arith.constant 0 : index
    %163 = vector.load %arg18[%c0_68, %c0_69, %c0_70] : memref<1x1x32xf32, #tpu.memory_space<vmem>>, vector<1x1x32xf32>
    %164 = vector.shape_cast %163 : vector<1x1x32xf32> to vector<1x32xf32>
    %165 = vector.broadcast %164 : vector<1x32xf32> to vector<16x32xf32>
    %166 = arith.mulf %162, %165 : vector<16x32xf32>
    %c0_71 = arith.constant 0 : index
    %c0_72 = arith.constant 0 : index
    %c0_73 = arith.constant 0 : index
    %167 = vector.load %arg19[%c0_71, %c0_72, %c0_73] : memref<1x1x32xf32, #tpu.memory_space<vmem>>, vector<1x1x32xf32>
    %168 = vector.shape_cast %167 : vector<1x1x32xf32> to vector<1x32xf32>
    %169 = vector.broadcast %168 : vector<1x32xf32> to vector<16x32xf32>
    %170 = arith.addf %166, %169 : vector<16x32xf32>
    %c0_74 = arith.constant 0 : index
    %c0_75 = arith.constant 0 : index
    %c0_76 = arith.constant 0 : index
    %171 = vector.load %arg14[%c0_74, %c0_75, %c0_76] : memref<1x32x64xf32, #tpu.memory_space<vmem>>, vector<1x32x64xf32>
    %172 = vector.shape_cast %171 : vector<1x32x64xf32> to vector<32x64xf32>
    %cst_77 = arith.constant dense<0.000000e+00> : vector<16x64xf32>
    %173 = tpu.matmul %170, %172, %cst_77 {dimension_numbers = #tpu.dot_dimension_numbers<[1], [0], [0], [1], [0, 0, 1, 1], [], []>} : vector<16x32xf32>, vector<32x64xf32>, vector<16x64xf32> -> vector<16x64xf32>
    %c0_78 = arith.constant 0 : index
    %c0_79 = arith.constant 0 : index
    %c0_80 = arith.constant 0 : index
    %174 = vector.load %arg15[%c0_78, %c0_79, %c0_80] : memref<1x1x64xf32, #tpu.memory_space<vmem>>, vector<1x1x64xf32>
    %175 = vector.shape_cast %174 : vector<1x1x64xf32> to vector<1x64xf32>
    %176 = vector.broadcast %175 : vector<1x64xf32> to vector<16x64xf32>
    %177 = arith.addf %173, %176 : vector<16x64xf32>
    %cst_81 = arith.constant 0.000000e+00 : f32
    %178 = vector.broadcast %cst_81 : f32 to vector<16x64xf32>
    %179 = arith.maximumf %177, %178 : vector<16x64xf32>
    %c0_82 = arith.constant 0 : index
    %c0_83 = arith.constant 0 : index
    %c0_84 = arith.constant 0 : index
    %180 = vector.load %arg16[%c0_82, %c0_83, %c0_84] : memref<1x64x32xf32, #tpu.memory_space<vmem>>, vector<1x64x32xf32>
    %181 = vector.shape_cast %180 : vector<1x64x32xf32> to vector<64x32xf32>
    %cst_85 = arith.constant dense<0.000000e+00> : vector<16x32xf32>
    %182 = tpu.matmul %179, %181, %cst_85 {dimension_numbers = #tpu.dot_dimension_numbers<[1], [0], [0], [1], [0, 0, 1, 1], [], []>} : vector<16x64xf32>, vector<64x32xf32>, vector<16x32xf32> -> vector<16x32xf32>
    %c0_86 = arith.constant 0 : index
    %c0_87 = arith.constant 0 : index
    %c0_88 = arith.constant 0 : index
    %183 = vector.load %arg17[%c0_86, %c0_87, %c0_88] : memref<1x1x32xf32, #tpu.memory_space<vmem>>, vector<1x1x32xf32>
    %184 = vector.shape_cast %183 : vector<1x1x32xf32> to vector<1x32xf32>
    %185 = vector.broadcast %184 : vector<1x32xf32> to vector<16x32xf32>
    %186 = arith.addf %182, %185 : vector<16x32xf32>
    %cst_89 = arith.constant dense<0.000000e+00> : vector<16xf32>
    %187 = vector.multi_reduction <add>, %186, %cst_89 [1] : vector<16x32xf32> to vector<16xf32>
    %188 = vector.shape_cast %187 : vector<16xf32> to vector<16x1xf32>
    %cst_90 = arith.constant 3.200000e+01 : f32
    %189 = vector.broadcast %cst_90 : f32 to vector<16x1xf32>
    %190 = arith.divf %188, %189 : vector<16x1xf32>
    %191 = vector.broadcast %190 : vector<16x1xf32> to vector<16x32xf32>
    %192 = arith.subf %186, %191 : vector<16x32xf32>
    %193 = arith.mulf %192, %192 : vector<16x32xf32>
    %cst_91 = arith.constant dense<0.000000e+00> : vector<16xf32>
    %194 = vector.multi_reduction <add>, %193, %cst_91 [1] : vector<16x32xf32> to vector<16xf32>
    %195 = vector.shape_cast %194 : vector<16xf32> to vector<16x1xf32>
    %cst_92 = arith.constant 3.200000e+01 : f32
    %196 = vector.broadcast %cst_92 : f32 to vector<16x1xf32>
    %197 = arith.divf %195, %196 : vector<16x1xf32>
    %198 = vector.broadcast %190 : vector<16x1xf32> to vector<16x32xf32>
    %199 = arith.subf %186, %198 : vector<16x32xf32>
    %cst_93 = arith.constant 9.99999974E-6 : f32
    %200 = vector.broadcast %cst_93 : f32 to vector<16x1xf32>
    %201 = arith.addf %197, %200 : vector<16x1xf32>
    %202 = math.rsqrt %201 : vector<16x1xf32>
    %203 = vector.broadcast %202 : vector<16x1xf32> to vector<16x32xf32>
    %204 = arith.mulf %199, %203 : vector<16x32xf32>
    %c0_94 = arith.constant 0 : index
    %c0_95 = arith.constant 0 : index
    %c0_96 = arith.constant 0 : index
    %205 = vector.load %arg20[%c0_94, %c0_95, %c0_96] : memref<1x1x32xf32, #tpu.memory_space<vmem>>, vector<1x1x32xf32>
    %206 = vector.shape_cast %205 : vector<1x1x32xf32> to vector<1x32xf32>
    %207 = vector.broadcast %206 : vector<1x32xf32> to vector<16x32xf32>
    %208 = arith.mulf %204, %207 : vector<16x32xf32>
    %c0_97 = arith.constant 0 : index
    %c0_98 = arith.constant 0 : index
    %c0_99 = arith.constant 0 : index
    %209 = vector.load %arg21[%c0_97, %c0_98, %c0_99] : memref<1x1x32xf32, #tpu.memory_space<vmem>>, vector<1x1x32xf32>
    %210 = vector.shape_cast %209 : vector<1x1x32xf32> to vector<1x32xf32>
    %211 = vector.broadcast %210 : vector<1x32xf32> to vector<16x32xf32>
    %212 = arith.addf %208, %211 : vector<16x32xf32>
    %c0_100 = arith.constant 0 : index
    %c0_101 = arith.constant 0 : index
    %213 = vector.load %arg22[%c0_100, %c0_101] : memref<16x32xf32, #tpu.memory_space<vmem>>, vector<16x32xf32>
    tpu.vector_store %arg22[%c0_100, %c0_101], %212 {strides = array<i32>} : memref<16x32xf32, #tpu.memory_space<vmem>>, vector<16x32xf32>,
    return
  }
  func.func @transform_0(%arg0: i32, %arg1: i32) -> (i32, i32) {
    %c0_i32 = arith.constant 0 : i32
    %c0_i32_0 = arith.constant 0 : i32
    return %arg0, %c0_i32 : i32, i32
  }
  func.func @transform_1(%arg0: i32, %arg1: i32) -> (i32, i32) {
    %c0_i32 = arith.constant 0 : i32
    %c0_i32_0 = arith.constant 0 : i32
    return %arg0, %c0_i32 : i32, i32
  }
  func.func @transform_2(%arg0: i32, %arg1: i32) -> (i32, i32) {
    %c0_i32 = arith.constant 0 : i32
    %c0_i32_0 = arith.constant 0 : i32
    return %arg0, %c0_i32 : i32, i32
  }
  func.func @transform_3(%arg0: i32, %arg1: i32) -> (i32, i32, i32) {
    %c0_i32 = arith.constant 0 : i32
    %c0_i32_0 = arith.constant 0 : i32
    %c0_i32_1 = arith.constant 0 : i32
    return %arg0, %c0_i32, %c0_i32_0 : i32, i32, i32
  }
  func.func @transform_4(%arg0: i32, %arg1: i32) -> (i32, i32, i32) {
    %c0_i32 = arith.constant 0 : i32
    %c0_i32_0 = arith.constant 0 : i32
    %c0_i32_1 = arith.constant 0 : i32
    return %arg1, %c0_i32, %c0_i32_0 : i32, i32, i32
  }
  func.func @transform_5(%arg0: i32, %arg1: i32) -> (i32, i32, i32) {
    %c0_i32 = arith.constant 0 : i32
    %c0_i32_0 = arith.constant 0 : i32
    %c0_i32_1 = arith.constant 0 : i32
    return %arg1, %c0_i32, %c0_i32_0 : i32, i32, i32
  }
  func.func @transform_6(%arg0: i32, %arg1: i32) -> (i32, i32, i32) {
    %c0_i32 = arith.constant 0 : i32
    %c0_i32_0 = arith.constant 0 : i32
    %c0_i32_1 = arith.constant 0 : i32
    return %arg1, %c0_i32, %c0_i32_0 : i32, i32, i32
  }
  func.func @transform_7(%arg0: i32, %arg1: i32) -> (i32, i32, i32) {
    %c0_i32 = arith.constant 0 : i32
    %c0_i32_0 = arith.constant 0 : i32
    %c0_i32_1 = arith.constant 0 : i32
    return %arg1, %c0_i32, %c0_i32_0 : i32, i32, i32
  }
  func.func @transform_8(%arg0: i32, %arg1: i32) -> (i32, i32, i32) {
    %c0_i32 = arith.constant 0 : i32
    %c0_i32_0 = arith.constant 0 : i32
    %c0_i32_1 = arith.constant 0 : i32
    return %arg1, %c0_i32, %c0_i32_0 : i32, i32, i32
  }
  func.func @transform_9(%arg0: i32, %arg1: i32) -> (i32, i32, i32) {
    %c0_i32 = arith.constant 0 : i32
    %c0_i32_0 = arith.constant 0 : i32
    %c0_i32_1 = arith.constant 0 : i32
    return %arg1, %c0_i32, %c0_i32_0 : i32, i32, i32
  }
  func.func @transform_10(%arg0: i32, %arg1: i32) -> (i32, i32, i32) {
    %c0_i32 = arith.constant 0 : i32
    %c0_i32_0 = arith.constant 0 : i32
    %c0_i32_1 = arith.constant 0 : i32
    return %arg1, %c0_i32, %c0_i32_0 : i32, i32, i32
  }
  func.func @transform_11(%arg0: i32, %arg1: i32) -> (i32, i32, i32) {
    %c0_i32 = arith.constant 0 : i32
    %c0_i32_0 = arith.constant 0 : i32
    %c0_i32_1 = arith.constant 0 : i32
    return %arg1, %c0_i32, %c0_i32_0 : i32, i32, i32
  }
  func.func @transform_12(%arg0: i32, %arg1: i32) -> (i32, i32, i32) {
    %c0_i32 = arith.constant 0 : i32
    %c0_i32_0 = arith.constant 0 : i32
    %c0_i32_1 = arith.constant 0 : i32
    return %arg1, %c0_i32, %c0_i32_0 : i32, i32, i32
  }
  func.func @transform_13(%arg0: i32, %arg1: i32) -> (i32, i32, i32) {
    %c0_i32 = arith.constant 0 : i32
    %c0_i32_0 = arith.constant 0 : i32
    %c0_i32_1 = arith.constant 0 : i32
    return %arg1, %c0_i32, %c0_i32_0 : i32, i32, i32
  }
  func.func @transform_14(%arg0: i32, %arg1: i32) -> (i32, i32, i32) {
    %c0_i32 = arith.constant 0 : i32
    %c0_i32_0 = arith.constant 0 : i32
    %c0_i32_1 = arith.constant 0 : i32
    return %arg1, %c0_i32, %c0_i32_0 : i32, i32, i32
  }
  func.func @transform_15(%arg0: i32, %arg1: i32) -> (i32, i32, i32) {
    %c0_i32 = arith.constant 0 : i32
    %c0_i32_0 = arith.constant 0 : i32
    %c0_i32_1 = arith.constant 0 : i32
    return %arg1, %c0_i32, %c0_i32_0 : i32, i32, i32
  }
  func.func @transform_16(%arg0: i32, %arg1: i32) -> (i32, i32, i32) {
    %c0_i32 = arith.constant 0 : i32
    %c0_i32_0 = arith.constant 0 : i32
    %c0_i32_1 = arith.constant 0 : i32
    return %arg1, %c0_i32, %c0_i32_0 : i32, i32, i32
  }
  func.func @transform_17(%arg0: i32, %arg1: i32) -> (i32, i32, i32) {
    %c0_i32 = arith.constant 0 : i32
    %c0_i32_0 = arith.constant 0 : i32
    %c0_i32_1 = arith.constant 0 : i32
    return %arg1, %c0_i32, %c0_i32_0 : i32, i32, i32
  }
  func.func @transform_18(%arg0: i32, %arg1: i32) -> (i32, i32, i32) {
    %c0_i32 = arith.constant 0 : i32
    %c0_i32_0 = arith.constant 0 : i32
    %c0_i32_1 = arith.constant 0 : i32
    return %arg1, %c0_i32, %c0_i32_0 : i32, i32, i32
  }
  func.func @transform_19(%arg0: i32, %arg1: i32) -> (i32, i32, i32) {
    %c0_i32 = arith.constant 0 : i32
    %c0_i32_0 = arith.constant 0 : i32
    %c0_i32_1 = arith.constant 0 : i32
    return %arg1, %c0_i32, %c0_i32_0 : i32, i32, i32
  }
  func.func @transform_20(%arg0: i32, %arg1: i32) -> (i32, i32) {
    %c0_i32 = arith.constant 0 : i32
    %c0_i32_0 = arith.constant 0 : i32
    return %arg0, %c0_i32 : i32, i32
  }
  func.func @transform_21(%arg0: i32, %arg1: i32) -> (i32, i32, i32, i32) {
    %c0_i32 = arith.constant 0 : i32
    %c0_i32_0 = arith.constant 0 : i32
    %c0_i32_1 = arith.constant 0 : i32
    return %arg1, %arg0, %c0_i32, %c0_i32_0 : i32, i32, i32, i32
  }
}

</mosaic_0001>

<bundles_post_ra>
// kernel: tpu_custom_call.1
= control target key start
LH: loop header
LB: loop body
LE: loop exit
PB: predicated region body
PF: predicated region fallthrough
CT: control target
= control target key end

     0   :  { %s4272_s0 = inlined_call_operand.hbm [shape: f32[32,32], index: 0, kind: input, shape index: {}]   ;;  %s4273_s1 = inlined_call_operand.hbm [shape: f32[32,32], index: 1, kind: input, shape index: {}]   ;;  %s4274_s2 = inlined_call_operand.hbm [shape: f32[32,32], index: 2, kind: input, shape index: {}]   ;;  %s4275_s3 = inlined_call_operand.hbm [shape: f32[4,1,8], index: 3, kind: input, shape index: {}]   ;;  %s4276_s4 = inlined_call_operand.vmem [shape: f32[2,32,32], index: 4, kind: input, shape index: {}]   ;;  %s4277_s5 = inlined_call_operand.vmem [shape: f32[2,32,32], index: 5, kind: input, shape index: {}]   ;;  %s4278_s6 = inlined_call_operand.vmem [shape: f32[2,32,32], index: 6, kind: input, shape index: {}]   ;;  %s4279_s7 = inlined_call_operand.vmem [shape: f32[2,1,32], index: 7, kind: input, shape index: {}]   ;;  %s4280_s8 = inlined_call_operand.vmem [shape: f32[2,1,32], index: 8, kind: input, shape index: {}]   ;;  %s4281_s9 = inlined_call_operand.vmem [shape: f32[2,1,32], index: 9, kind: input, shape index: {}]   ;;  %s4282_s10 = inlined_call_operand.hbm [shape: f32[2,32,32], index: 10, kind: input, shape index: {}]   ;;  %s4283_s11 = inlined_call_operand.vmem [shape: f32[2,1,32], index: 11, kind: input, shape index: {}]   ;;  %s4284_s12 = inlined_call_operand.hbm [shape: f32[2,32,64], index: 12, kind: input, shape index: {}]   ;;  %s4285_s13 = inlined_call_operand.vmem [shape: f32[2,1,64], index: 13, kind: input, shape index: {}]   ;;  %s4286_s14 = inlined_call_operand.vmem [shape: f32[2,64,32], index: 14, kind: input, shape index: {}]   ;;  %s4287_s15 = inlined_call_operand.vmem [shape: f32[2,1,32], index: 15, kind: input, shape index: {}]   ;;  %s4288_s16 = inlined_call_operand.vmem [shape: f32[2,1,32], index: 16, kind: input, shape index: {}]   ;;  %s4289_s17 = inlined_call_operand.hbm [shape: f32[2,1,32], index: 17, kind: input, shape index: {}]   ;;  %s4290_s18 = inlined_call_operand.vmem [shape: f32[2,1,32], index: 18, kind: input, shape index: {}]   ;;  %s4291_s19 = inlined_call_operand.hbm [shape: f32[2,1,32], index: 19, kind: input, shape index: {}]   ;;  %s4292_s20 = inlined_call_operand.hbm [shape: f32[32,32], index: 20, kind: output, shape index: {0}]   ;;  %s4293_s21 = inlined_call_operand.hbm [shape: f32[2,4,8,8], index: 21, kind: output, shape index: {1}]  }
   0x1   :  { %4337 = sst [smem:[#allocation54_spill]] %s4272_s0 }
   0x2   :  { %4338 = sst [smem:[#allocation55_spill]] %s4273_s1 }
   0x3   :  { %4339 = sst [smem:[#allocation56_spill]] %s4274_s2 }
   0x4   :  { %4340 = sst [smem:[#allocation57_spill]] %s4275_s3 }
   0x5   :  { %4341 = sst [smem:[#allocation58_spill]] %s4276_s4 }
   0x6   :  { %4342 = sst [smem:[#allocation59_spill]] %s4277_s5 }
   0x7   :  { %4343 = sst [smem:[#allocation60_spill]] %s4278_s6 }
   0x8   :  { %4344 = sst [smem:[#allocation61_spill]] %s4279_s7 }
   0x9   :  { %4345 = sst [smem:[#allocation62_spill]] %s4280_s8 }
   0xa   :  { %4346 = sst [smem:[#allocation63_spill]] %s4281_s9 }
   0xb   :  { %4347 = sst [smem:[#allocation64_spill]] %s4282_s10 }
   0xc   :  { %4348 = sst [smem:[#allocation65_spill]] %s4283_s11 }
   0xd   :  { %4349 = sst [smem:[#allocation66_spill]] %s4284_s12 }
   0xe   :  { %4350 = sst [smem:[#allocation67_spill]] %s4285_s13 }
   0xf   :  { %4351 = sst [smem:[#allocation68_spill]] %s4286_s14 }
  0x10   :  { %4352 = sst [smem:[#allocation69_spill]] %s4287_s15 }
  0x11   :  { %4353 = sst [smem:[#allocation70_spill]] %s4288_s16 }
  0x12   :  { %4354 = sst [smem:[#allocation71_spill]] %s4289_s17 }
  0x13   :  { %4355 = sst [smem:[#allocation72_spill]] %s4290_s18 }
  0x14   :  { %4356 = sst [smem:[#allocation73_spill]] %s4291_s19 }
  0x15   :  { %4357 = sst [smem:[#allocation74_spill]] %s4292_s20 }
  0x16   :  { %4358 = sst [smem:[#allocation75_spill]] %s4293_s21 }
  0x17   :  { %27 = vsyncpa [#allocation3], 0 }
  0x18   :  { %29 = vsyncpa [#allocation3 + $0x1], 0 }
  0x19   :  { %30 = vsyncpa [#allocation6], 0 }
  0x1a   :  { %32 = vsyncpa [#allocation6 + $0x1], 0 }
  0x1b   :  { %33 = vsyncpa [#allocation9], 0 }
  0x1c   :  { %35 = vsyncpa [#allocation9 + $0x1], 0 }
  0x1d   :  { %36 = vsyncpa [#allocation12], 0 }
  0x1e   :  { %38 = vsyncpa [#allocation12 + $0x1], 0 }
  0x1f   :  { %39 = vsyncpa [#allocation15], 0 }
  0x20   :  { %41 = vsyncpa [#allocation15 + $0x1], 0 }
  0x21   :  { %42 = vsyncpa [#allocation4], 0 }
  0x22   :  { %44 = vsyncpa [#allocation4 + $0x1], 0 }
  0x23   :  { %45 = vsyncpa [#allocation18], 0 }
  0x24   :  { %47 = vsyncpa [#allocation18 + $0x1], 0  ;;  %s3494_s2 = smov 0   ;;  %s3496_s25 = smov 0  }
  0x25   :  { %s3498_s26 = smov 0   ;;  %s3500_s27 = smov 0  }
  0x26   :  { %s3502_s3 = smov 0   ;;  %s3504_s28 = smov 0  }
  0x27   :  { %s3506_s29 = smov 0   ;;  %s3508_s0 = smov 0  }
  0x28   :  { %s3510_s4 = smov 0   ;;  %s3512_s30 = smov 0  }
  0x29   :  { %s3514_s5 = smov 0   ;;  %s3516_s22 = smov 0  }
  0x2a   :  { %s3518_s23 = smov 0   ;;  %s3520_s1 = smov 0  }
  0x2b LB: > { %4359 = sst [smem:[#allocation27_spill]] %s3320_s2  ;;  %s3565_s24 = sadd.s32 4294967295, %s3372_s1   ;;  %s3372_s1 = sphi %s3520_s1, %s53_s1   ;;  %s3368_s23 = sphi %s3518_s23, %s4486_s23   ;;  %s3364_s22 = sphi %s3516_s22, %s4485_s22   ;;  %s3360_s5 = sphi %s3514_s5, %s4484_s5   ;;  %s3356_s30 = sphi %s3512_s30, %s4483_s30   ;;  %s3352_s4 = sphi %s3510_s4, %s4482_s4   ;;  %s3348_s0 = sphi %s3508_s0, %s4481_s0   ;;  %s3344_s29 = sphi %s3506_s29, %s4480_s29   ;;  %s3340_s28 = sphi %s3504_s28, %s4479_s28   ;;  %s3336_s3 = sphi %s3502_s3, %s4478_s3   ;;  %s3332_s27 = sphi %s3500_s27, %s4477_s27   ;;  %s3328_s26 = sphi %s3498_s26, %s4476_s26   ;;  %s3324_s25 = sphi %s3496_s25, %s4475_s25   ;;  %s3320_s2 = sphi %s3494_s2, %s4474_s2  }
  0x2c   : > { %4360 = sst [smem:[#allocation28_spill]] %s3324_s25  ;;  %s2596_s20 = sadd.s32 4294967294, %s3372_s1  }
  0x2d   : > { %4361 = sst [smem:[#allocation29_spill]] %s3328_s26  ;;  %p79_p0 = scmp.ne.s32.totalorder %s3352_s4, %s3348_s0 }
  0x2e   : > { %4362 = sst [smem:[#allocation30_spill]] %s3336_s3  ;;  %p80_p1 = scmp.eq.s32.totalorder %s3372_s1, 0 }
  0x2f   : > { %4363 = sst [smem:[#allocation31_spill]] %s3340_s28  ;;  %p85_p2 = scmp.ne.s32.totalorder %s3348_s0, %s3344_s29 }
  0x30   : > { %4364 = sst [smem:[#allocation32_spill]] %s3344_s29  ;;  %p4298_p3 = scmp.eq.s32.totalorder %s3565_s24, 0 }
  0x31   : > { %4365 = sst [smem:[#allocation33_spill]] %s3348_s0  ;;  %p3578_p4 = por %p80_p1, %p79_p0 }
  0x32   : > { %4366 = sst [smem:[#allocation34_spill]] %s3352_s4  ;;  %p603_p5 = scmp.eq.s32.totalorder %s3565_s24, 3 }
  0x33   : > { %4367 = sst [smem:[#allocation35_spill]] %s3356_s30  ;;  %p3585_p6 = por %p4298_p3, %p85_p2 }
  0x34   : > { %4368 = sst [smem:[#allocation36_spill]] %s3360_s5  ;;  %p609_p7 = scmp.eq.s32.totalorder %s2596_s20, 3 }
  0x35   : > { %4369 = sst [smem:[#allocation37_spill]] %s3364_s22  ;;  %p3589_p8 = por %p603_p5, %p79_p0 }
  0x36   : > { %4370 = sst [smem:[#allocation38_spill]] %s3368_s23  ;;  %p630_p9 = scmp.ne.s32.totalorder %s3328_s26, %s3324_s25 }
  0x37   : > { %4371 = sst [smem:[#allocation39_spill]] %s3372_s1  ;;  %p3595_p10 = por %p609_p7, %p85_p2 }
  0x38   : > { %4372 = sst [smem:[#allocation40_spill]] %s3565_s24  ;;  %p636_p11 = scmp.ne.s32.totalorder %s3324_s25, %s3320_s2 }
  0x39   : > { %s4374_s21 = scalar_select %p3585_p6, 1, 0 }
  0x3a   : > { %s4376_s5 = scalar_select %p3589_p8, 1, 0 }
  0x3b   : > { %4375 = sst [smem:[#allocation41_spill]] %s4374_s21  ;;  %p3601_p12 = por %p630_p9, %p603_p5 }
  0x3c   : > { %4377 = sst [smem:[#allocation42_spill]] %s4376_s5  ;;  %p3605_p13 = por %p636_p11, %p609_p7 }
  0x3d   : > { %s4378_s29 = scalar_select %p3595_p10, 1, 0 }
  0x3e   : > { %s4380_s16 = scalar_select %p3601_p12, 1, 0 }
  0x3f   : > { %4379 = sst [smem:[#allocation43_spill]] %s4378_s29  ;;  %p4318_p3 = scmp.lt.s32.totalorder %s3372_s1, 4 }
  0x40   : > { %4381 = sst [smem:[#allocation44_spill]] %s4380_s16  ;;  %s3611_s20 = sand.u32 1, %s3352_s4  }
  0x41   : > { %s4382_s15 = scalar_select %p3605_p13, 1, 0 }
  0x42   : > { %s3614_s5 = sshll.u32 %s3368_s23, 4  ;;  %s3617_s29 = sshll.u32 %s3611_s20, 4 }
  0x43   : > { %4383 = sst [smem:[#allocation45_spill]] %s4382_s15  ;;  %p3623_p0 = pnand %p4318_p3, %p3578_p4 }
  0x44   : > { %s3628_s15 = sand.u32 1, %s3372_s1   ;;  %s4385_s13 = sld [smem:[#allocation55_spill]] }
  0x45   : > { %s683_s9 = scalar_lea.vmem [#allocation5], %s3617_s29  ;;  %p2616_p2 = scmp.ge.s32.totalorder %s3372_s1, 1 }
  0x46   : > { %s691_s8 = sshll.u32 %s683_s9, 4  ;;  %s4313_s18 = scalar_lea.sflag [#allocation6], %s3628_s15  ;;  %s692_s8 = int_to_ptr.vmem [resolvable:$true] %s691_s8 }
  0x47   : > { %s4314_s7 = smov 128   ;;  %s4316_s30 = smov 8  }
  0x48   : > { %p900_p4 = scmp.lt.s32.totalorder %s3372_s1, 5  ;;  %s2608_s9 = sshll.u32 %s3611_s20, 1 }
  0x49   : > { %s4387_s25 = sld [smem:[#allocation57_spill]]  ;;  %s727_s0 = scalar_lea.vmem [#allocation8], %s2608_s9 }
  0x4a   : > { %s688_s11 = scalar_lea.hbm %s4385_s13, %s3614_s5  ;;  %p3647_p5 = pnand %p2616_p2, %p900_p4 }
  0x4b   : > { %s689_s6 = sshll.u32 %s688_s11, 4  ;;  %s2609_s11 = sshll.u32 %s3368_s23, 1  ;;  %s690_s6 = int_to_ptr.hbm [resolvable:$true] %s689_s6 }
  0x4c   : > { %2725 = dma.hbm_to_vmem [thread:$0]  (!%p3623_p0), %s690_s6, 256, %s692_s8, %s4313_s18, %s4314_s7, %s4314_s7, %s4316_s30  }
  0x4d   : > { %s734_s6 = sshll.u32 %s727_s0, 4  ;;  %s4319_s18 = scalar_lea.sflag [#allocation9], %s3628_s15  ;;  %s735_s6 = int_to_ptr.vmem [resolvable:$true] %s734_s6 }
  0x4e   : > { %s3376_s7 = smov 16   ;;  %s3377_s30 = smov 1  }
  0x4f   : > { %s731_s21 = scalar_lea.hbm %s4387_s25, %s2609_s11  ;;  %s62_s25 = sadd.s32 1, %s3364_s22 }
  0x50   : > { %s732_s8 = sshll.u32 %s731_s21, 4  ;;  %p63_p7 = scmp.ge.s32.totalorder %s62_s25, 2  ;;  %s733_s8 = int_to_ptr.hbm [resolvable:$true] %s732_s8 }
  0x51   : > { %2731 = dma.hbm_to_vmem [thread:$0]  (!%p3623_p0), %s733_s8, 32, %s735_s6, %s4319_s18, %s3376_s7, %s3376_s7, %s3377_s30  }
  0x52   : > { %s332_s9 = sadd.s32 1, %s3340_s28  ;;  %p339_p9 = scmp.ne.s32.totalorder %s3340_s28, %s3336_s3 }
  0x53   : > { %p345_p11 = scmp.ne.s32.totalorder %s3336_s3, %s3332_s27  ;;  %s4488_s25 = smov (%p63_p7, %s62_s25), 0 }
  0x54   : > { %4388 = sst [smem:[#allocation46_spill]] %s4488_s25  ;;  %s4389_s21 = sadd.s32 1, %s3368_s23 }
  0x55   : > { %s4490_s21 = smov (!%p63_p7, %s4389_s21), %s3368_s23  ;;  %s329_s0 = ssub.s32 %s3364_s22, %s4488_s25 }
  0x56   : > { %p3674_p2 = por %p339_p9, %p80_p1  ;;  %p67_p4 = scmp.ge.s32.totalorder %s4490_s21, 2 }
  0x57   : > { %p330_p3 = scmp.eq.s32.totalorder %s329_s0, 0  ;;  %p4391_p13 = scmp.eq.s32.totalorder %s3565_s24, 0 }
  0x58   : > { %s620_s30 = sadd.s32 1, %s3328_s26  ;;  %s4492_s21 = smov (%p67_p4, %s4490_s21), 0 }
  0x59   : > { %p3680_p10 = por %p345_p11, %p4391_p13  ;;  %4394 = sst [smem:[#allocation48_spill]] %s4492_s21 }
  0x5a   : > { %s3688_s11 = scalar_select %p330_p3, %s3340_s28, %s332_s9  }
  0x5b   : > { %s4392_s27 = scalar_select %p3680_p10, 1, 0 }
  0x5c   : > { %4395 = sst [smem:[#allocation49_spill]] %s3688_s11  ;;  %s69_s14 = ssub.s32 %s3368_s23, %s4492_s21 }
  0x5d   : > { %4393 = sst [smem:[#allocation47_spill]] %s4392_s27  ;;  %s3693_s16 = sand.u32 1, %s3340_s28  }
  0x5e   : > { %p70_p1 = scmp.eq.s32.totalorder %s69_s14, 0  ;;  %s617_s6 = sor.u32 %s329_s0, %s69_s14 }
  0x5f   : > { %p618_p7 = scmp.eq.s32.totalorder %s617_s6, 0  ;;  %s2610_s8 = sshll.u32 %s3693_s16, 5 }
  0x60   : > { %s4396_s18 = sadd.s32 1, %s3352_s4  ;;  %s2688_s3 = sshll.u32 %s3364_s22, 5 }
  0x61   : > { %s3699_s25 = scalar_select %p70_p1, %s3352_s4, %s4396_s18  }
  0x62   : > { %s3702_s27 = scalar_select %p618_p7, %s3328_s26, %s620_s30  }
  0x63   : > { %4397 = sst [smem:[#allocation50_spill]] %s3699_s25  ;;  %s790_s21 = scalar_lea.vmem [#allocation10], %s2610_s8 }
  0x64   : > { %4398 = sst [smem:[#allocation51_spill]] %s3702_s27  ;;  %s798_s23 = sshll.u32 %s790_s21, 4  ;;  %s3708_s23 = int_to_ptr.vmem [resolvable:$true] %s798_s23 }
  0x65   : > { %s4399_s10 = sld [smem:[#allocation64_spill]]  ;;  %p4400_p3 = scmp.lt.s32.totalorder %s3372_s1, 4 }
  0x66   : > { %s4402_s12 = sld [smem:[#allocation66_spill]]  ;;  %s815_s7 = scalar_lea.sflag [#allocation12], %s3628_s15 }
  0x67   : > { %p3716_p13 = pnand %p4400_p3, %p3674_p2  ;;  %s4403_s6 = smov 8  }
  0x68   : > { %s4404_s9 = smov 128   ;;  %s4405_s30 = sld [smem:[#allocation54_spill]] }
  0x69   : > { %s4409_s17 = sld [smem:[#allocation71_spill]] }
  0x6a   : > { %s4410_s19 = sld [smem:[#allocation73_spill]] }
  0x6b   : > { %s795_s11 = scalar_lea.hbm %s4399_s10, %s2688_s3 }
  0x6c   : > { %s796_s28 = sshll.u32 %s795_s11, 4  ;;  %s823_s24 = scalar_lea.hbm %s4402_s12, %s2688_s3  ;;  %s3710_s28 = int_to_ptr.hbm [resolvable:$true] %s796_s28 }
  0x6d   : > { %s824_s21 = sshll.u32 %s823_s24, 4  ;;  %s818_s11 = scalar_lea.vmem [#allocation11], %s2610_s8  ;;  %s825_s21 = int_to_ptr.hbm [resolvable:$true] %s824_s21 }
  0x6e   : > { %s826_s14 = sshll.u32 %s818_s11, 4  ;;  %s666_s3 = scalar_lea.hbm %s4405_s30, %s3614_s5  ;;  %s827_s14 = int_to_ptr.vmem [resolvable:$true] %s826_s14 }
  0x6f   : > { %2737 = dma.hbm_to_vmem [thread:$0]  (!%p3716_p13), %s825_s21, 512, %s827_s14, %s815_s7, %s4404_s9, %s4404_s9, %s4403_s6  }
  0x70   : > { %s661_s8 = scalar_lea.vmem [#allocation2], %s3617_s29  ;;  %s667_s11 = sshll.u32 %s666_s3, 4  ;;  %s668_s11 = int_to_ptr.hbm [resolvable:$true] %s667_s11 }
  0x71   : > { %s669_s24 = sshll.u32 %s661_s8, 4  ;;  %s658_s12 = scalar_lea.sflag [#allocation3], %s3611_s20  ;;  %s670_s24 = int_to_ptr.vmem [resolvable:$true] %s669_s24 }
  0x72   : > { %2722 = dma.hbm_to_vmem [thread:$0]  (!%p3623_p0), %s668_s11, 256, %s670_s24, %s658_s12, %s4404_s9, %s4404_s9, %s4403_s6  }
  0x73   : > { %s4406_s14 = sld [smem:[#allocation56_spill]]  ;;  %s705_s30 = scalar_lea.vmem [#allocation7], %s3617_s29 }
  0x74   : > { %s713_s25 = sshll.u32 %s705_s30, 4  ;;  %s4407_s20 = scalar_lea.sflag [#allocation6], %s3628_s15  ;;  %s714_s25 = int_to_ptr.vmem [resolvable:$true] %s713_s25 }
  0x75   : > { %s4408_s12 = scalar_lea.sflag [#allocation9], %s3628_s15  ;;  %s868_s3 = scalar_lea.hbm %s4409_s17, %s3364_s22 }
  0x76   : > { %2734 = dma.hbm_to_vmem [thread:$0]  (!%p3716_p13), %s3710_s28, 512, %s3708_s23, %s4408_s12, %s4404_s9, %s4404_s9, %s4403_s6  }
  0x77   : > { %s865_s8 = scalar_lea.vmem [#allocation13], %s3693_s16  ;;  %s870_s2 = sshll.u32 %s868_s3, 4  ;;  %s871_s2 = int_to_ptr.hbm [resolvable:$true] %s870_s2 }
  0x78   : > { %s872_s24 = sshll.u32 %s865_s8, 4  ;;  %s888_s21 = scalar_lea.vmem [#allocation14], %s3693_s16  ;;  %s873_s24 = int_to_ptr.vmem [resolvable:$true] %s872_s24 }
  0x79   : > { %s710_s0 = scalar_lea.hbm %s4406_s14, %s3614_s5  ;;  %s895_s15 = sshll.u32 %s888_s21, 4  ;;  %s896_s15 = int_to_ptr.vmem [resolvable:$true] %s895_s15 }
  0x7a   : > { %s711_s4 = sshll.u32 %s710_s0, 4  ;;  %s886_s28 = scalar_lea.sflag [#allocation15], %s3693_s16  ;;  %s712_s4 = int_to_ptr.hbm [resolvable:$true] %s711_s4 }
  0x7b   : > { %2728 = dma.hbm_to_vmem [thread:$0]  (!%p3623_p0), %s712_s4, 256, %s714_s25, %s4407_s20, %s4404_s9, %s4404_s9, %s4403_s6  }
  0x7c   : > { %2740 = dma.hbm_to_vmem [thread:$0]  (!%p3716_p13), %s871_s2, 16, %s873_s24, %s815_s7  }
  0x7d   : > { %s891_s25 = scalar_lea.hbm %s4410_s19, %s3364_s22  ;;  %904 = sbr.rel (%p3647_p5) target bundleno = 2713 (0xa99), region = 100 }
  0x7e   : > { %s893_s10 = sshll.u32 %s891_s25, 4  ;;  %s894_s10 = int_to_ptr.hbm [resolvable:$true] %s893_s10 }
  0x7f   : > { %2743 = dma.hbm_to_vmem [thread:$0]  (!%p3716_p13), %s894_s10, 16, %s896_s15, %s886_s28  }
  0x82   : > { %s4411_s23 = sld [smem:[#allocation33_spill]] }
  0x88   : > { %s3779_s9 = sand.u32 1, %s4411_s23  }
  0x89   : > { %4413 = sst [smem:[#allocation52_spill]] %s3779_s9  ;;  %s3782_s7 = sshll.u32 %s3779_s9, 4 }
  0x8a   : > { %s907_s14 = scalar_lea.sflag [#allocation3], %s3779_s9 }
  0x8b   : > { %3287 = dma.done.wait (%p3585_p6), %s907_s14, 256  }
  0x8c   : > { %3289 = vsyncadd (%p3585_p6), %s907_s14, 4294967040  ;;  %s4414_s16 = sld [smem:[#allocation40_spill]] }
  0x92   : > { %s916_s13 = sand.u32 1, %s4414_s16  }
  0x93   : > { %s917_s18 = scalar_lea.sflag [#allocation6], %s916_s13 }
  0x94   : > { %3291 = dma.done.wait (%p3585_p6), %s917_s18, 512  }
  0x95   : > { %3293 = vsyncadd (%p3585_p6), %s917_s18, 4294966784  ;;  %s2620_s20 = sshll.u32 %s3779_s9, 1  ;;  %s937_s29 = scalar_lea.sflag [#allocation9], %s916_s13 }
  0x96   : > { %s3798_s5 = scalar_lea.vmem [#allocation8], %s2620_s20 }
  0x97   : > { %3295 = dma.done.wait (%p3585_p6), %s937_s29, 32  }
  0x98   : > { %3297 = vsyncadd (%p3585_p6), %s937_s29, 4294967264  ;;  %s4415_s3 = sld [smem:[#allocation30_spill]] }
  0x9e   : > { %s3805_s24 = sand.u32 1, %s4415_s3  }
  0x9f   : > { %4417 = sst [smem:[#allocation53_spill]] %s3805_s24  ;;  %s2621_s2 = sshll.u32 %s3805_s24, 5 }
  0xa0   : > { %s3808_s11 = scalar_lea.vmem [#allocation10], %s2621_s2 }
  0xa1   : > { %3299 = dma.done.wait (%p3680_p10), %s937_s29, 512  }
  0xa2   : > { %3301 = vsyncadd (%p3680_p10), %s937_s29, 4294966784  ;;  %s957_s4 = scalar_lea.sflag [#allocation12], %s916_s13  ;;  %s3814_s25 = scalar_lea.vmem [#allocation11], %s2621_s2 }
  0xa3   : > { %3303 = dma.done.wait (%p3680_p10), %s957_s4, 528  }
  0xa4   : > { %3305 = vsyncadd (%p3680_p10), %s957_s4, 4294966768  ;;  %s976_s21 = scalar_lea.sflag [#allocation15], %s3805_s24 }
  0xa5   : > { %3307 = dma.done.wait (%p3680_p10), %s976_s21, 16  }
  0xa6   : > { %3309 = vsyncadd (%p3680_p10), %s976_s21, 4294967280  ;;  %s4418_s28 = sld [smem:[#allocation28_spill]]  ;;  %s3890_s15 = scalar_lea.vmem [#allocation16], %s3782_s7 }
  0xa7   : > { %s4419_s23 = sld [smem:[#allocation35_spill]] }
  0xa8   : > { %s4421_s4 = sld [smem:[#allocation58_spill]] }
  0xa9   : > { %s4423_s0 = sld [smem:[#allocation60_spill]] }
  0xaa   : > { %s4428_s12 = sld [smem:[#allocation68_spill]] }
  0xab   : > { %s4429_s27 = sld [smem:[#allocation69_spill]] }
  0xac   : > { %s4329_s6 = sand.u32 1, %s4418_s28   ;;  %s4427_s28 = sld [smem:[#allocation67_spill]] }
  0xad   : > { %s2624_s14 = sshll.u32 %s4329_s6, 4  ;;  %p1124_p6 = scmp.lt.s32.totalorder %s4419_s23, 1 }
  0xae   : > { %p1170_p0 = scmp.eq.s32.totalorder %s4419_s23, 0  ;;  %s4422_s6 = sld [smem:[#allocation59_spill]] }
  0xaf   : > { %s3833_s16 = scalar_select %p1124_p6, %s4419_s23, 1 }
  0xb0   : > { %s4430_s29 = sld [smem:[#allocation70_spill]]  ;;  %p2633_p10 = scmp.ne.s32.totalorder %s4419_s23, 0 }
  0xb1   : > { %s2690_s13 = sshll.u32 %s3833_s16, 5  ;;  %s2693_s24 = sshll.u32 %s3833_s16, 6 }
  0xb2   : > { %s3843_s21 = scalar_lea.vmem %s4421_s4, %s2690_s13  ;;  %s3853_s17 = scalar_lea.vmem %s4423_s0, %s2690_s13 }
  0xb3   : > { %s1153_s9 = scalar_lea.vmem %s4427_s28, %s3833_s16  ;;  %s1161_s18 = scalar_lea.vmem %s4429_s27, %s3833_s16 }
  0xb4   : > { %s3848_s10 = scalar_lea.vmem %s4422_s6, %s2690_s13  ;;  %s3875_s13 = scalar_lea.vmem %s4428_s12, %s2693_s24 }
  0xb5   : > { %s4431_s4 = sld [smem:[#allocation72_spill]]  ;;  %s3892_s6 = scalar_lea.vmem [#allocation17], %s2624_s14 }
  0xb6   : > { %s1164_s8 = scalar_lea.vmem %s4430_s29, %s3833_s16  ;;  %s4432_s24 = scalar_lea.vmem (!%p2633_p10), [#allocation2], %s3782_s7 }
  0xb7   : > { %1173 = sbr.rel (%p2633_p10) target bundleno = 191 (0xbf), region = 136  ;;  %s4433_s28 = smov (!%p2633_p10), %s4432_s24 }
  0xbb   : > { %s1167_s1 = scalar_lea.vmem %s4431_s4, %s3833_s16 }
  0xbc   : > { %v1174_v0 = vld [vmem:[%s4432_s24] sm:$0xff]  ;;  %vm1176_vm0 = vcmask 261120   ;;  %v1175_v1 = vld [vmem:[%s4433_s28 + $0x8] sm:$0xff] }
  0xbd   : > { %1177 = vst.msk [vmem:[%s3890_s15] sm:$0xff] %vm1176_vm0, %v1174_v0 }
  0xbe   : > { %1178 = vst.msk [vmem:[%s3890_s15 + $0x8] sm:$0xff] %vm1176_vm0, %v1175_v1 }
  0xbf PF: > { %s4434_s14 = sld [smem:[#allocation35_spill]]  ;;  %v1233_v2 = vld [vmem:[%s3848_s10 + $0x18] sm:$0xff]  ;;  %v1232_v4 = vld [vmem:[%s3848_s10 + $0x10] sm:$0xff]  ;;  %v1231_v6 = vld [vmem:[%s3848_s10 + $0x8] sm:$0xff]  ;;  %s4435_s30 = scalar_lea.vmem [#allocation5], %s3782_s7  ;;  %vm1200_vm2 = vcmask 261120  }
  0xc0   : > { %v1195_v3 = vld [vmem:[%s3843_s21 + $0x18] sm:$0xff]  ;;  %s1183_s23 = scalar_select %p1170_p0, 1, 0  ;;  %1256 = vmatpush.msra.mxu1 %v1233_v2  ;;  %v1194_v5 = vld [vmem:[%s3843_s21 + $0x10] sm:$0xff]  ;;  %v1193_v7 = vld [vmem:[%s3843_s21 + $0x8] sm:$0xff]  ;;  %vm1318_vm3 = vcmask 64512  }
  0xc1   : > { %1219 = vmatpush.msra.mxu0 %v1195_v3  ;;  %2695 = vmatpush.msra.mxu2 %v1195_v3  ;;  %v1181_v10 = vld [vmem:[%s4435_s30] sm:$0xff]  ;;  %v1270_v16 = vld [vmem:[%s3853_s17 + $0x18] sm:$0xff]  ;;  %v1268_v18 = vld [vmem:[%s3853_s17 + $0x8] sm:$0xff]  ;;  %s4439_s12 = sld [smem:[#allocation62_spill]]  ;;  %s4443_s29 = smov %s4435_s30  ;;  %vm2083_vm11 = vcmask 523264  }
  0xc2   : > { %v1184_v9 = vstv %s1183_s23  ;;  %1257 = vmatpush.msra.mxu1 %v1232_v4  ;;  %v1230_v12 = vld [vmem:[%s3848_s10] sm:$0xff]  ;;  %v1269_v17 = vld [vmem:[%s3853_s17 + $0x10] sm:$0xff]  ;;  %s4438_s10 = scalar_lea.vmem [#allocation7], %s3782_s7  ;;  %s4441_s20 = sld [smem:[#allocation61_spill]]  ;;  %v1182_v28 = vld [vmem:[%s4443_s29 + $0x8] sm:$0xff] }
  0xc3   : > { %1220 = vmatpush.msra.mxu0 %v1194_v5  ;;  %vm3912_vm1 = vcmp.eq.s32.totalorder %v1184_v9, 1  ;;  %2696 = vmatpush.msra.mxu2 %v1194_v5  ;;  %v1192_v13 = vld [vmem:[%s3843_s21] sm:$0xff]  ;;  %s4444_s4 = sld [smem:[#allocation63_spill]]  ;;  %s3379_s28 = smov 112  }
  0xc4   : > { %v1179_v8 = vld [vmem:[%s3890_s15] sm:$0xff]  ;;  %1258 = vmatpush.msra.mxu1 %v1231_v6  ;;  %v1188_v19 = vld [vmem:[%s4438_s10] sm:$0xff]  ;;  %s4446_s23 = smov %s4438_s10  ;;  %s3380_s7 = smov 104  }
  0xc5   : > { %1221 = vmatpush.msra.mxu0 %v1193_v7  ;;  %v1186_v14 = vsel %vm3912_vm1, %v1181_v10, %v1179_v8  ;;  %v3921_v15 = vld [vmem:[%s3890_s15 + $0x8] sm:$0xff]  ;;  %2697 = vmatpush.msra.mxu2 %v1193_v7  ;;  %v1190_v21 = vsel %vm3912_vm1, %v1188_v19, %v1179_v8  ;;  %v1189_v46 = vld [vmem:[%s4446_s23 + $0x8] sm:$0xff]  ;;  %s4447_s10 = sld [smem:[#allocation65_spill]]  ;;  %s2681_s2 = sshll.u32 %s4434_s14, 2 }
  0xc6   : > { %1259 = vmatpush.msra.mxu1 %v1230_v12  ;;  %v1267_v20 = vld [vmem:[%s3853_s17] sm:$0xff]  ;;  %s3378_s17 = smov 120   ;;  %v1187_v30 = vsel %vm3912_vm1, %v1182_v28, %v3921_v15  ;;  %v1191_v47 = vsel %vm3912_vm1, %v1189_v46, %v3921_v15  ;;  %s4457_s23 = sld [smem:[#allocation75_spill]] }
  0xc7   : > { %1222 = vmatpush.msra.mxu0 %v1192_v13  ;;  %2636 = vmatmul.msk.f32.vlgmr.msra.gmra.mxu1 %vm1200_vm2, %v1186_v14  ;;  %s4440_s19 = scalar_lea.vmem %s4439_s12, %s3833_s16  ;;  %v3986_v41 = vld [vmem:[%s3798_s5] ss:$0 sm:$0xff]  ;;  %v4002_v54 = vld [vmem:[%s3798_s5 + $0x1] ss:$0 sm:$0xff]  ;;  %v1308_v14 = vld [vmem:[%s3808_s11] sm:$0xff]  ;;  %s2208_s30 = sshll.u32 %s3892_s6, 4  ;;  %s2209_s30 = int_to_ptr.vmem [resolvable:$true] %s2208_s30 }
  0xc8   : > { %2698 = vmatpush.msra.mxu2 %v1192_v13  ;;  %2634 = vmatmul.msk.f32.vlgmr.msra.gmra.mxu0 %vm1200_vm2, %v1179_v8  ;;  %v2880_v22 = vld [vmem:[%s4440_s19] ss:$0 sm:$0xff]  ;;  %s4442_s3 = scalar_lea.vmem %s4441_s20, %s3833_s16 }
  0xc9   : > { %2635 = vmatmul.msk.f32.vlgmr.msra.gmra.mxu2 %vm1200_vm2, %v3921_v15  ;;  %v2881_v23 = vld [vmem:[%s4442_s3] ss:$0 sm:$0xff]  ;;  %s4445_s24 = scalar_lea.vmem %s4444_s4, %s3833_s16 }
  0xca   : > { %1293 = vmatpush.msrb.mxu2 %v1270_v16  ;;  %v2882_v33 = vld [vmem:[%s4445_s24] ss:$0 sm:$0xff] }
  0xcb   : > { %s4448_s21 = scalar_lea.vmem %s4447_s10, %s3833_s16 }
  0xcc   : > { %1294 = vmatpush.msrb.mxu2 %v1269_v17 }
  0xce   : > { %1295 = vmatpush.msrb.mxu2 %v1268_v18 }
  0xcf   : > { %2637 = vmatmul.msk.f32.gmra.mxu1 %vm1200_vm2, %v1187_v30 }
  0xd0   : > { %1296 = vmatpush.msrb.mxu2 %v1267_v20 }
  0xd1   : > { %2638 = vmatmul.msk.f32.vlgmr.msrb.gmra.mxu2 %vm1200_vm2, %v1190_v21 }
  0xd9   : > { %2639 = vmatmul.msk.f32.gmra.mxu2 %vm1200_vm2, %v1191_v47 }
 0x144   : > { %v1261_v24 = vpop.f32.mrf.mxu1 }
 0x145   : > { %v3946_v25 = vadd.f32 %v2880_v22, %v1261_v24  ;;  %v1224_v26 = vpop.f32.mrf.mxu0 }
 0x146   : > { %v1225_v27 = vadd.f32 %v2881_v23, %v1224_v26 }
 0x147   : > { %1443 = vrot.lane.b32.xlu0 %v3946_v25, %s3378_s17  ;;  %2640 = vmatpush.xpose.msk.msra.mxu3 %vm1318_vm3, %v3946_v25 }
 0x148   : > { %v3954_v29 = vmul.f32 0.35355338, %v1225_v27 }
 0x14a   : > { %2641 = vmatmul.msk.f32.vlgmr.msra.gmra.mxu3 %vm1318_vm3, %v3954_v29 }
 0x14c   : > { %v1227_v31 = vpop.f32.mrf.mxu2  ;;  %v1264_v38 = vpop.f32.mrf.mxu1 }
 0x14d   : > { %v1228_v32 = vadd.f32 %v2881_v23, %v1227_v31  ;;  %v3979_v39 = vadd.f32 %v2880_v22, %v1264_v38  ;;  %v1309_v23 = vld [vmem:[%s3808_s11 + $0x8] sm:$0xff] }
 0x14f   : > { %1441 = vrot.lane.b32.xlu0 %v3954_v29, %s3378_s17  ;;  %v3981_v40 = vmul.f32 0.35355338, %v1228_v32  ;;  %2642 = vmatpush.xpose.msk.msrb.mxu3 %vm1318_vm3, %v3979_v39 }
 0x152   : > { %2643 = vmatmul.msk.f32.vlgmr.msrb.gmra.mxu3 %vm1318_vm3, %v3981_v40 }
 0x154   : > { %v1298_v34 = vpop.f32.mrf.mxu2 }
 0x155   : > { %v3969_v35 = vadd.f32 %v2882_v33, %v1298_v34 }
 0x157   : > { %1522 = vrot.lane.b32.xlu0 %v3969_v35, %s3378_s17  ;;  %1413 = vmatpush.msra.mxu3 %v3969_v35 }
 0x15c   : > { %v1301_v60 = vpop.f32.mrf.mxu2 }
 0x15d   : > { %v4009_v61 = vadd.f32 %v2882_v33, %v1301_v60 }
 0x15f   : > { %1635 = vrot.lane.b32.xlu0 %v3946_v25, %s3379_s28  ;;  %1436 = vmatpush.msrb.mxu0 %v4009_v61 }
 0x167   : > { %1633 = vrot.lane.b32.xlu0 %v3954_v29, %s3379_s28 }
 0x1b9   : > { %v1444_v36 = vpop.permute.xlu0 %1443 }
 0x1ba   : > { %2646 = vmatpush.xpose.msk.msrb.mxu1 %vm1318_vm3, %v1444_v36 }
 0x1be   : > { %1596 = vmatpush.msra.mxu1 %v1309_v23 }
 0x1c1   : > { %v1442_v37 = vpop.permute.xlu0 %1441 }
 0x1c2   : > { %2647 = vmatmul.msk.f32.vlgmr.msrb.gmra.mxu1 %vm1318_vm3, %v1442_v37 }
 0x1c9   : > { %v1523_v42 = vpop.permute.xlu0 %1522 }
 0x1ca   : > { %1543 = vmatpush.msrb.mxu3 %v1523_v42 }
 0x1cd   : > { %v1342_v43 = vpop.f32.mrf.mxu3 }
 0x1ce   : > { %v1343_v44 = vadd.f32 %v3986_v41, %v1342_v43 }
 0x1d0   : > { %v1371_v45 = vsel %vm1318_vm3, %v1343_v44, -inf }
 0x1d1   : > { %1372 = vmax.xlane.f32.xlu1 %v1371_v45  ;;  %v1636_v6 = vpop.permute.xlu0 %1635 }
 0x1d5   : > { %v1368_v56 = vpop.f32.mrf.mxu3 }
 0x1d6   : > { %v1369_v58 = vadd.f32 %v4002_v54, %v1368_v56 }
 0x1d8   : > { %v1374_v59 = vsel %vm1318_vm3, %v1369_v58, -inf }
 0x1d9   : > { %1375 = vmax.xlane.f32.xlu0 %v1374_v59  ;;  %v1634_v8 = vpop.permute.xlu0 %1633 }
 0x23f   : > { %v1466_v48 = vpop.f32.mrf.mxu1 }
 0x240   : > { %v1467_v49 = vadd.f32 %v3986_v41, %v1466_v48 }
 0x242   : > { %v1497_v50 = vsel %vm1318_vm3, %v1467_v49, -inf }
 0x243   : > { %1498 = vmax.xlane.f32.xlu1 %v1497_v50 }
 0x244   : > { %v1373_v51 = vpop.xlane.xlu1 %1372 }
 0x245   : > { %v1377_v52 = vsub.f32 %v1343_v44, %v1373_v51 }
 0x247   : > { %v1379_v53 = vmul.f32 1.442695, %v1377_v52 }
 0x249   : > { %2892 = vpow2.f32 %v1379_v53 }
 0x24c   : > { %v1376_v9 = vpop.xlane.xlu0 %1375 }
 0x24d   : > { %v1378_v10 = vsub.f32 %v1369_v58, %v1376_v9 }
 0x24f   : > { %v2893_v55 = vpop.eup %2892  ;;  %v1381_v11 = vmul.f32 1.442695, %v1378_v10 }
 0x250   : > { %v1383_v57 = vsel %vm1318_vm3, %v2893_v55, 0.0 }
 0x251   : > { %1384 = vadd.xlane.f32.xlu2 %v1383_v57 }
 0x25c   : > { %1471 = vrot.lane.b32.xlu1 %v3979_v39, %s3378_s17 }
 0x2b6   : > { %v1499_v62 = vpop.xlane.xlu1 %1498 }
 0x2b7   : > { %v1503_v63 = vsub.f32 %v1467_v49, %v1499_v62  ;;  %v1310_v62 = vld [vmem:[%s3808_s11 + $0x10] sm:$0xff] }
 0x2b8   : > { %1786 = vmatpush.msrb.mxu1 %v1310_v62 }
 0x2b9   : > { %v1505_v0 = vmul.f32 1.442695, %v1503_v63 }
 0x2bb   : > { %2894 = vpow2.f32 %v1505_v0 }
 0x2c1   : > { %v2895_v1 = vpop.eup %2894 }
 0x2c2   : > { %v1509_v2 = vsel %vm1318_vm3, %v2895_v1, 0.0 }
 0x2c3   : > { %1510 = vadd.xlane.f32.xlu2 %v1509_v2 }
 0x2c4   : > { %v1385_v3 = vpop.xlane.xlu2 %1384 }
 0x2c5   : > { %2896 = vrcp.f32 %v1385_v3 }
 0x2c6   : > { %2898 = vpow2.f32 %v1381_v11 }
 0x2cb   : > { %v2897_v4 = vpop.eup %2896 }
 0x2cc   : > { %v4013_v5 = vmul.f32 %v2897_v4, %v2893_v55  ;;  %v2899_v12 = vpop.eup %2898 }
 0x2cd   : > { %v1386_v13 = vsel %vm1318_vm3, %v2899_v12, 0.0 }
 0x2ce   : > { %2644 = vmatmul.msk.f32.vlgmr.msra.gmra.mxu3 %vm1318_vm3, %v4013_v5  ;;  %v1472_v7 = vpop.permute.xlu1 %1471 }
 0x2cf   : > { %2656 = vmatpush.xpose.msk.msra.mxu3 %vm1318_vm3, %v1636_v6  ;;  %2648 = vmatpush.xpose.msk.msra.mxu2 %vm1318_vm3, %v1472_v7 }
 0x2d3   : > { %1625 = vmatpush.msrb.mxu2 %v1308_v14 }
 0x2db   : > { %1469 = vrot.lane.b32.xlu2 %v3981_v40, %s3378_s17 }
 0x304   : > { %1387 = vadd.xlane.f32.xlu2 %v1386_v13 }
 0x336   : > { %v1511_v15 = vpop.xlane.xlu2 %1510 }
 0x337   : > { %2900 = vrcp.f32 %v1511_v15 }
 0x33d   : > { %v2901_v16 = vpop.eup %2900 }
 0x33e   : > { %v1517_v17 = vmul.f32 %v2901_v16, %v2895_v1  ;;  %v1470_v18 = vpop.permute.xlu2 %1469 }
 0x33f   : > { %2649 = vmatmul.msk.f32.vlgmr.msra.gmra.mxu2 %vm1318_vm3, %v1470_v18 }
 0x340   : > { %2650 = vmatmul.msk.f32.vlgmr.msrb.gmra.mxu3 %vm1318_vm3, %v1517_v17  ;;  %v1519_v55 = vadd.f32 %v1517_v17, %v4013_v5 }
 0x348   : > { %2657 = vmatmul.msk.f32.vlgmr.msra.gmra.mxu3 %vm1318_vm3, %v1634_v8 }
 0x351   : > { %v1415_v19 = vpop.f32.mrf.mxu3 }
 0x352   : > { %2654 = vmatmul.msk.f32.vlgmr.msrb.gmra.mxu2 %vm1318_vm3, %v1415_v19 }
 0x377   : > { %v1388_v20 = vpop.xlane.xlu2 %1387 }
 0x378   : > { %2902 = vrcp.f32 %v1388_v20 }
 0x37e   : > { %v2903_v21 = vpop.eup %2902 }
 0x37f   : > { %v4027_v22 = vmul.f32 %v2903_v21, %v2899_v12 }
 0x381   : > { %2645 = vmatmul.msk.f32.vlgmr.msrb.gmra.mxu0 %vm1318_vm3, %v4027_v22 }
 0x3c2   : > { %v1494_v24 = vpop.f32.mrf.mxu2 }
 0x3c3   : > { %v1495_v26 = vadd.f32 %v4002_v54, %v1494_v24  ;;  %v1545_v27 = vpop.f32.mrf.mxu3 }
 0x3c4   : > { %2652 = vmatmul.msk.f32.vlgmr.msra.gmra.mxu1 %vm1318_vm3, %v1545_v27 }
 0x3c5   : > { %v1500_v28 = vsel %vm1318_vm3, %v1495_v26, -inf }
 0x3c6   : > { %1501 = vmax.xlane.f32.xlu1 %v1500_v28  ;;  %v2875_v28 = vpack.i.bf16 %v4009_v61, %v3969_v35 }
 0x3cb   : > { %v1658_v30 = vpop.f32.mrf.mxu3 }
 0x3cc   : > { %v1659_v31 = vadd.f32 %v3986_v41, %v1658_v30 }
 0x3ce   : > { %v1689_v32 = vsel %vm1318_vm3, %v1659_v31, -inf }
 0x3cf   : > { %1690 = vmax.xlane.f32.xlu2 %v1689_v32 }
 0x3d5   : > { %v4074_v3 = vpop.f32.mrf.mxu2 }
 0x3df   : > { %1663 = vrot.lane.b32.xlu1 %v3979_v39, %s3379_s28 }
 0x3e7   : > { %1549 = vrot.lane.b32.xlu2 %v4009_v61, %s3378_s17 }
 0x3ef   : > { %1661 = vrot.lane.b32.xlu2 %v3981_v40, %s3379_s28 }
 0x3f7   : > { %1824 = vrot.lane.b32.xlu2 %v3981_v40, %s3380_s7 }
 0x3fe   : > { %v1438_v33 = vpop.f32.mrf.mxu0 }
 0x3ff   : > { %2655 = vmatmul.msk.f32.gmra.mxu2 %vm1318_vm3, %v1438_v33 }
 0x439   : > { %v1502_v34 = vpop.xlane.xlu1 %1501 }
 0x43a   : > { %v1504_v36 = vsub.f32 %v1495_v26, %v1502_v34 }
 0x43c   : > { %v1507_v37 = vmul.f32 1.442695, %v1504_v36 }
 0x43e   : > { %2904 = vpow2.f32 %v1507_v37 }
 0x442   : > { %v1691_v38 = vpop.xlane.xlu2 %1690 }
 0x443   : > { %v1695_v42 = vsub.f32 %v1659_v31, %v1691_v38 }
 0x444   : > { %v2905_v43 = vpop.eup %2904 }
 0x445   : > { %v1697_v44 = vmul.f32 1.442695, %v1695_v42  ;;  %v1512_v45 = vsel %vm1318_vm3, %v2905_v43, 0.0 }
 0x446   : > { %1513 = vadd.xlane.f32.xlu0 %v1512_v45 }
 0x447   : > { %2906 = vpow2.f32 %v1697_v44 }
 0x44a   : > { %v1550_v46 = vpop.permute.xlu2 %1549 }
 0x44b   : > { %1570 = vmatpush.msra.mxu0 %v1550_v46 }
 0x44d   : > { %v2907_v47 = vpop.eup %2906 }
 0x44e   : > { %v1701_v40 = vsel %vm1318_vm3, %v2907_v47, 0.0 }
 0x44f   : > { %1702 = vadd.xlane.f32.xlu1 %v1701_v40 }
 0x451   : > { %v1664_v48 = vpop.permute.xlu1 %1663 }
 0x452   : > { %2658 = vmatpush.xpose.msk.msrb.mxu0 %vm1318_vm3, %v1664_v48 }
 0x45a   : > { %1713 = vrot.lane.b32.xlu0 %v3969_v35, %s3379_s28 }
 0x462   : > { %1798 = vrot.lane.b32.xlu0 %v3946_v25, %s3380_s7  ;;  %v1662_v25 = vpop.permute.xlu2 %1661 }
 0x468   : > { %1826 = vrot.lane.b32.xlu1 %v3979_v39, %s3380_s7 }
 0x46a   : > { %1796 = vrot.lane.b32.xlu0 %v3954_v29, %s3380_s7  ;;  %v1825_v60 = vpop.permute.xlu2 %1824 }
 0x482   : > { %v4077_v5 = vpop.f32.mrf.mxu2 }
 0x4b9   : > { %v1514_v49 = vpop.xlane.xlu0 %1513 }
 0x4ba   : > { %2908 = vrcp.f32 %v1514_v49  ;;  %v1311_v49 = vld [vmem:[%s3808_s11 + $0x18] sm:$0xff]  ;;  %s4449_s11 = sld [smem:[#allocation53_spill]] }
 0x4c0   : > { %v2909_v50 = vpop.eup %2908  ;;  %s4451_s19 = scalar_lea.vmem [#allocation13], %s4449_s11 }
 0x4c1   : > { %v4057_v51 = vmul.f32 %v2909_v50, %v2905_v43 }
 0x4c2   : > { %v1703_v52 = vpop.xlane.xlu1 %1702 }
 0x4c3   : > { %2910 = vrcp.f32 %v1703_v52  ;;  %2651 = vmatmul.msk.f32.vlgmr.msra.gmra.mxu0 %vm1318_vm3, %v4057_v51  ;;  %v1520_v37 = vadd.f32 %v4057_v51, %v4027_v22  ;;  %v1598_v52 = vpop.f32.mrf.mxu1 }
 0x4c9   : > { %v2911_v53 = vpop.eup %2910 }
 0x4ca   : > { %v1709_v56 = vmul.f32 %v2911_v53, %v2907_v47 }
 0x4cb   : > { %2659 = vmatmul.msk.f32.vlgmr.msrb.gmra.mxu0 %vm1318_vm3, %v1662_v25  ;;  %v1628_v25 = vadd.f32 %v4074_v3, %v1598_v52 }
 0x4cc   : > { %v4063_v39 = vadd.f32 %v1709_v56, %v1519_v55  ;;  %v1714_v29 = vpop.permute.xlu0 %1713 }
 0x4cd   : > { %1734 = vmatpush.msrb.mxu3 %v1714_v29 }
 0x4ce   : > { %2660 = vmatmul.msk.f32.vlgmr.msrb.gmra.mxu3 %vm1318_vm3, %v1709_v56 }
 0x4d4   : > { %v1799_v57 = vpop.permute.xlu0 %1798 }
 0x4d5   : > { %2664 = vmatpush.xpose.msk.msra.mxu2 %vm1318_vm3, %v1799_v57 }
 0x4da   : > { %v1827_v58 = vpop.permute.xlu1 %1826 }
 0x4db   : > { %2666 = vmatpush.xpose.msk.msra.mxu3 %vm1318_vm3, %v1827_v58 }
 0x4dc   : > { %v1797_v59 = vpop.permute.xlu0 %1796 }
 0x4dd   : > { %2665 = vmatmul.msk.f32.vlgmr.msra.gmra.mxu2 %vm1318_vm3, %v1797_v59 }
 0x4de   : > { %2667 = vmatmul.msk.f32.vlgmr.msra.gmra.mxu3 %vm1318_vm3, %v1825_v60 }
 0x4df   : > { %1949 = vmatpush.msrb.mxu3 %v1311_v49  ;;  %v2887_v49 = vld [vmem:[%s4451_s19] ss:$0 sm:$0xff] }
 0x540   : > { %v1572_v63 = vpop.f32.mrf.mxu0 }
 0x541   : > { %2653 = vmatmul.msk.f32.gmra.mxu1 %vm1318_vm3, %v1572_v63 }
 0x548   : > { %v1686_v0 = vpop.f32.mrf.mxu0 }
 0x549   : > { %v1687_v1 = vadd.f32 %v4002_v54, %v1686_v0 }
 0x54b   : > { %v1692_v2 = vsel %vm1318_vm3, %v1687_v1, -inf }
 0x54c   : > { %1693 = vmax.xlane.f32.xlu1 %v1692_v2 }
 0x551   : > { %v1736_v4 = vpop.f32.mrf.mxu3 }
 0x552   : > { %2662 = vmatmul.msk.f32.vlgmr.msrb.gmra.mxu1 %vm1318_vm3, %v1736_v4  ;;  %v3381_v4 = vmov 32.0  }
 0x560   : > { %v1821_v6 = vpop.f32.mrf.mxu2 }
 0x561   : > { %v1822_v7 = vadd.f32 %v3986_v41, %v1821_v6  ;;  %v1849_v8 = vpop.f32.mrf.mxu3 }
 0x562   : > { %v1850_v9 = vadd.f32 %v4002_v54, %v1849_v8 }
 0x563   : > { %v1852_v10 = vsel %vm1318_vm3, %v1822_v7, -inf }
 0x564   : > { %1853 = vmax.xlane.f32.xlu0 %v1852_v10  ;;  %v1855_v11 = vsel %vm1318_vm3, %v1850_v9, -inf }
 0x565   : > { %1856 = vmax.xlane.f32.xlu2 %v1855_v11 }
 0x57d   : > { %1739 = vrot.lane.b32.xlu2 %v4009_v61, %s3379_s28 }
 0x5be   : > { %v1601_v53 = vpop.f32.mrf.mxu1 }
 0x5bf   : > { %v1694_v12 = vpop.xlane.xlu1 %1693  ;;  %v1631_v60 = vadd.f32 %v4077_v5, %v1601_v53 }
 0x5c0   : > { %v1696_v13 = vsub.f32 %v1687_v1, %v1694_v12 }
 0x5c2   : > { %v1699_v14 = vmul.f32 1.442695, %v1696_v13 }
 0x5c4   : > { %2912 = vpow2.f32 %v1699_v14 }
 0x5ca   : > { %v2913_v15 = vpop.eup %2912 }
 0x5cb   : > { %v1704_v16 = vsel %vm1318_vm3, %v2913_v15, 0.0 }
 0x5cc   : > { %1705 = vadd.xlane.f32.xlu1 %v1704_v16 }
 0x5cf   : > { %v1788_v55 = vpop.f32.mrf.mxu1 }
 0x5d0   : > { %v1794_v56 = vadd.f32 %v1788_v55, %v1628_v25 }
 0x5d7   : > { %v1854_v41 = vpop.xlane.xlu0 %1853 }
 0x5d8   : > { %v1858_v17 = vsub.f32 %v1822_v7, %v1854_v41  ;;  %v1857_v54 = vpop.xlane.xlu2 %1856 }
 0x5d9   : > { %v1859_v18 = vsub.f32 %v1850_v9, %v1857_v54 }
 0x5da   : > { %v1860_v19 = vmul.f32 1.442695, %v1858_v17 }
 0x5db   : > { %v1862_v20 = vmul.f32 1.442695, %v1859_v18 }
 0x5dc   : > { %2914 = vpow2.f32 %v1860_v19  ;;  %v2035_v19 = vld [vmem:[%s3814_s25 + $0x18] sm:$0xff] }
 0x5dd   : > { %2916 = vpow2.f32 %v1862_v20  ;;  %v2034_v20 = vld [vmem:[%s3814_s25 + $0x10] sm:$0xff] }
 0x5e0   : > { %v1740_v21 = vpop.permute.xlu2 %1739 }
 0x5e1   : > { %1760 = vmatpush.msra.mxu0 %v1740_v21  ;;  %v2033_v21 = vld [vmem:[%s3814_s25 + $0x8] sm:$0xff] }
 0x5e2   : > { %v2915_v23 = vpop.eup %2914 }
 0x5e3   : > { %v2917_v24 = vpop.eup %2916  ;;  %v1864_v26 = vsel %vm1318_vm3, %v2915_v23, 0.0 }
 0x5e4   : > { %1865 = vadd.xlane.f32.xlu0 %v1864_v26  ;;  %v1867_v27 = vsel %vm1318_vm3, %v2917_v24, 0.0 }
 0x5e5   : > { %1868 = vadd.xlane.f32.xlu1 %v1867_v27 }
 0x5f8   : > { %2876 = vrot.lane.b32.xlu0 %v2875_v28, %s3380_s7  ;;  %v2078_v28 = vld [vmem:[%s3875_s13 + $0x38] sm:$0xff]  ;;  %s4458_s7 = smov %s4457_s23 }
 0x5f9   : > { %2098 = vmatpush.msra.mxu1 %v2078_v28 }
 0x63f   : > { %v1706_v30 = vpop.xlane.xlu1 %1705 }
 0x640   : > { %2918 = vrcp.f32 %v1706_v30  ;;  %v2077_v30 = vld [vmem:[%s3875_s13 + $0x30] sm:$0xff] }
 0x641   : > { %2099 = vmatpush.msra.mxu1 %v2077_v30 }
 0x646   : > { %v2919_v31 = vpop.eup %2918 }
 0x647   : > { %v1710_v32 = vmul.f32 %v2919_v31, %v2913_v15  ;;  %v2076_v31 = vld [vmem:[%s3875_s13 + $0x28] sm:$0xff] }
 0x648   : > { %2100 = vmatpush.msra.mxu1 %v2076_v31 }
 0x649   : > { %2661 = vmatmul.msk.f32.vlgmr.msra.gmra.mxu0 %vm1318_vm3, %v1710_v32  ;;  %v1712_v61 = vadd.f32 %v1710_v32, %v1520_v37 }
 0x657   : > { %v1866_v33 = vpop.xlane.xlu0 %1865 }
 0x658   : > { %2920 = vrcp.f32 %v1866_v33  ;;  %v1869_v34 = vpop.xlane.xlu1 %1868 }
 0x659   : > { %2922 = vrcp.f32 %v1869_v34  ;;  %v2075_v34 = vld [vmem:[%s3875_s13 + $0x20] sm:$0xff] }
 0x65a   : > { %2924 = vrcp.f32 %v3381_v4  ;;  %2101 = vmatpush.msra.mxu1 %v2075_v34  ;;  %v2889_v4 = vld [vmem:[%s1161_s18] ss:$0 sm:$0xff]  ;;  %s4455_s18 = sld [smem:[#allocation28_spill]] }
 0x65e   : > { %v2921_v36 = vpop.eup %2920 }
 0x65f   : > { %v2923_v38 = vpop.eup %2922  ;;  %v1872_v35 = vmul.f32 %v2921_v36, %v2915_v23  ;;  %v2032_v23 = vld [vmem:[%s3814_s25] sm:$0xff] }
 0x660   : > { %v1873_v42 = vmul.f32 %v2923_v38, %v2917_v24  ;;  %v2925_v6 = vpop.eup %2924  ;;  %v2074_v38 = vld [vmem:[%s3875_s13 + $0x18] sm:$0xff] }
 0x661   : > { %v1874_v43 = vadd.f32 %v1872_v35, %v4063_v39  ;;  %v2885_v39 = vld [vmem:[%s4448_s21] ss:$0 sm:$0xff]  ;;  %v1976_v7 = vmul.f32 32.0, %v2925_v6  ;;  %vm1980_vm4 = vweird.f32 %v2925_v6  ;;  %2102 = vmatpush.msra.mxu1 %v2074_v38  ;;  %s4459_s21 = sand.u32 1, %s4455_s18  }
 0x662   : > { %v1875_v44 = vadd.f32 %v1873_v42, %v1712_v61  ;;  %s2177_s25 = scalar_lea.sflag [#allocation18], %s4459_s21 }
 0x663   : > { %v1959_v45 = vmul.f32 0.25, %v1874_v43  ;;  %v1977_v8 = vsub.f32 1.0, %v1976_v7 }
 0x664   : > { %v1960_v46 = vmul.f32 0.25, %v1875_v44 }
 0x665   : > { %1961 = vst.msk [vmem:[%s3892_s6] sm:$0xff] %vm1318_vm3, %v1959_v45  ;;  %v1978_v9 = vmul.f32 %v2925_v6, %v1977_v8 }
 0x666   : > { %1962 = vst.msk [vmem:[%s3892_s6 + $0x8] sm:$0xff] %vm1318_vm3, %v1960_v46 }
 0x667   : > { %v1979_v10 = vadd.f32 %v2925_v6, %v1978_v9 }
 0x669   : > { %v4114_v5 = vsel %vm1980_vm4, %v2925_v6, %v1979_v10 }
 0x66a   : > { %v2877_v47 = vpop.permute.xlu0 %2876 }
 0x66b   : > { %v2879_v40 = vunpack.i.h.bf16 %v2877_v47  ;;  %v2878_v48 = vunpack.i.l.bf16 %v2877_v47  ;;  %v2886_v47 = vld [vmem:[%s1164_s8] ss:$0 sm:$0xff]  ;;  %s3194_s8 = scalar_lea.hbm %s4458_s7, 64 }
 0x66d   : > { %1897 = vmatpush.msrb.mxu0 %v2878_v48  ;;  %1923 = vmatpush.msrb.mxu2 %v2879_v40 }
 0x66e   : > { %2668 = vmatmul.msk.f32.vlgmr.msrb.gmra.mxu0 %vm1318_vm3, %v1872_v35  ;;  %2669 = vmatmul.msk.f32.vlgmr.msrb.gmra.mxu2 %vm1318_vm3, %v1873_v42 }
 0x66f   : > { %2058 = vmatpush.msra.mxu0 %v2035_v19 }
 0x671   : > { %2059 = vmatpush.msra.mxu0 %v2034_v20 }
 0x673   : > { %2060 = vmatpush.msra.mxu0 %v2033_v21 }
 0x675   : > { %2061 = vmatpush.msra.mxu0 %v2032_v23 }
 0x6c6   : > { %v1762_v22 = vpop.f32.mrf.mxu0 }
 0x6c7   : > { %2663 = vmatmul.msk.f32.gmra.mxu1 %vm1318_vm3, %v1762_v22 }
 0x6eb   : > { %v1899_v50 = vpop.f32.mrf.mxu0 }
 0x6ec   : > { %2670 = vmatmul.msk.f32.vlgmr.msrb.gmra.mxu3 %vm1318_vm3, %v1899_v50 }
 0x6f1   : > { %v1925_v51 = vpop.f32.mrf.mxu2 }
 0x6f4   : > { %2671 = vmatmul.msk.f32.gmra.mxu3 %vm1318_vm3, %v1925_v51 }
 0x744   : > { %v1791_v59 = vpop.f32.mrf.mxu1 }
 0x745   : > { %v1795_v63 = vadd.f32 %v1791_v59, %v1631_v60  ;;  %v2071_v59 = vld [vmem:[%s3875_s13] sm:$0xff] }
 0x746   : > { %v2888_v60 = vld [vmem:[%s1153_s9] ss:$0 sm:$0xff]  ;;  %s4454_s9 = sld [smem:[#allocation36_spill]] }
 0x74c   : > { %s2680_s29 = sshll.u32 %s4454_s9, 1 }
 0x74d   : > { %s2205_s26 = sadd.s32 %s2681_s2, %s2680_s29 }
 0x74e   : > { %s2682_s4 = sshll.u32 %s2205_s26, 3 }
 0x74f   : > { %s2207_s5 = scalar_lea.hbm %s4457_s23, %s2682_s4 }
 0x750   : > { %s2210_s10 = sshll.u32 %s2207_s5, 4  ;;  %s2211_s10 = int_to_ptr.hbm [resolvable:$true] %s2210_s10 }
 0x751   : > { %s3188_s0 = sshra.s32 %s2211_s10, 4  ;;  %s3189_s0 = int_to_ptr.hbm [resolvable:$true] %s3188_s0 }
 0x752   : > { %s3190_s12 = scalar_lea.hbm %s3189_s0, 16  ;;  %p3195_p2 = scmp.lt.s32.totalorder %s3189_s0, %s4458_s7 }
 0x753   : > { %p3191_p5 = scmp.ne.s32.totalorder %s3189_s0, %s3190_s12  ;;  %p3196_p4 = scmp.lt.s32.totalorder %s3194_s8, %s3190_s12 }
 0x755   : > { %p3192_p9 = pnand %p3191_p5, %p3601_p12  ;;  %p3197_p1 = por %p3196_p4, %p3195_p2 }
 0x757   : > { %p3193_p11 = pneg %p3192_p9 }
 0x759   : > { %p3198_p7 = pnand %p3197_p1, %p3193_p11 }
 0x76f   : > { %v1951_v29 = vpop.f32.mrf.mxu3 }
 0x770   : > { %v1957_v57 = vadd.f32 %v1951_v29, %v1794_v56 }
 0x772   : > { %v1967_v58 = vadd.f32 %v2885_v39, %v1957_v57  ;;  %v2073_v57 = vld [vmem:[%s3875_s13 + $0x10] sm:$0xff] }
 0x773   : > { %2103 = vmatpush.msra.mxu1 %v2073_v57 }
 0x774   : > { %v1969_v62 = vsel %vm1200_vm2, %v1967_v58, 0.0 }
 0x775   : > { %1970 = vadd.xlane.f32.xlu1 %v1969_v62 }
 0x777   : > { %v1954_v0 = vpop.f32.mrf.mxu3 }
 0x778   : > { %v1958_v1 = vadd.f32 %v1954_v0, %v1795_v63 }
 0x77a   : > { %v1968_v2 = vadd.f32 %v2885_v39, %v1958_v1 }
 0x77c   : > { %v1972_v3 = vsel %vm1200_vm2, %v1968_v2, 0.0 }
 0x77d   : > { %1973 = vadd.xlane.f32.xlu1 %v1972_v3 }
 0x7e8   : > { %v1971_v11 = vpop.xlane.xlu1 %1970 }
 0x7e9   : > { %v1982_v12 = vmul.f32 %v4114_v5, %v1971_v11 }
 0x7eb   : > { %v1984_v13 = vsub.f32 %v1967_v58, %v1982_v12  ;;  %v2072_v58 = vld [vmem:[%s3875_s13 + $0x8] sm:$0xff] }
 0x7ec   : > { %2104 = vmatpush.msra.mxu1 %v2072_v58 }
 0x7ed   : > { %v1986_v14 = vmul.f32 %v1984_v13, %v1984_v13 }
 0x7ee   : > { %2105 = vmatpush.msra.mxu1 %v2071_v59 }
 0x7ef   : > { %v1988_v15 = vsel %vm1200_vm2, %v1986_v14, 0.0 }
 0x7f0   : > { %1989 = vadd.xlane.f32.xlu2 %v1988_v15  ;;  %v1974_v16 = vpop.xlane.xlu1 %1973 }
 0x7f1   : > { %v1983_v41 = vmul.f32 %v4114_v5, %v1974_v16 }
 0x7f3   : > { %v1985_v17 = vsub.f32 %v1968_v2, %v1983_v41 }
 0x7f5   : > { %v1987_v54 = vmul.f32 %v1985_v17, %v1985_v17 }
 0x7f7   : > { %v1991_v18 = vsel %vm1200_vm2, %v1987_v54, 0.0 }
 0x7f8   : > { %1992 = vadd.xlane.f32.xlu0 %v1991_v18 }
 0x863   : > { %v1990_v24 = vpop.xlane.xlu2 %1989 }
 0x864   : > { %v1994_v26 = vmul.f32 %v1990_v24, %v4114_v5 }
 0x866   : > { %v1996_v27 = vadd.f32 1e-05, %v1994_v26 }
 0x868   : > { %2926 = vrsqrt.f32 %v1996_v27  ;;  %vm2004_vm6 = vweird.f32 %v1996_v27 }
 0x86b   : > { %v1993_v32 = vpop.xlane.xlu0 %1992 }
 0x86c   : > { %v1995_v33 = vmul.f32 %v1993_v32, %v4114_v5 }
 0x86e   : > { %v2927_v36 = vpop.eup %2926  ;;  %v1997_v37 = vadd.f32 1e-05, %v1995_v33 }
 0x86f   : > { %v1999_v35 = vmul.f32 %v2927_v36, %v1996_v27  ;;  %vm2005_vm5 = vweird.f32 %v2927_v36 }
 0x870   : > { %2928 = vrsqrt.f32 %v1997_v37  ;;  %vm2006_vm7 = vmor %vm2004_vm6, %vm2005_vm5  ;;  %vm2014_vm9 = vweird.f32 %v1997_v37 }
 0x871   : > { %v2000_v61 = vmul.f32 %v2927_v36, %v1999_v35 }
 0x873   : > { %v2001_v42 = vmul.f32 0.5, %v2000_v61 }
 0x875   : > { %v2002_v43 = vsub.f32 1.5, %v2001_v42 }
 0x876   : > { %v2929_v44 = vpop.eup %2928 }
 0x877   : > { %v2003_v45 = vmul.f32 %v2927_v36, %v2002_v43  ;;  %v2009_v46 = vmul.f32 %v2929_v44, %v1997_v37  ;;  %vm2015_vm8 = vweird.f32 %v2929_v44 }
 0x878   : > { %vm2016_vm10 = vmor %vm2014_vm9, %vm2015_vm8 }
 0x879   : > { %v2007_v40 = vsel %vm2006_vm7, %v2927_v36, %v2003_v45  ;;  %v2010_v48 = vmul.f32 %v2929_v44, %v2009_v46 }
 0x87a   : > { %v2018_v22 = vmul.f32 %v2007_v40, %v1984_v13 }
 0x87b   : > { %v2011_v50 = vmul.f32 0.5, %v2010_v48 }
 0x87c   : > { %v2024_v51 = vmul.f32 %v2886_v47, %v2018_v22 }
 0x87d   : > { %v2012_v52 = vsub.f32 1.5, %v2011_v50 }
 0x87e   : > { %v2030_v53 = vadd.f32 %v2887_v49, %v2024_v51 }
 0x87f   : > { %v2013_v55 = vmul.f32 %v2929_v44, %v2012_v52 }
 0x880   : > { %2672 = vmatmul.msk.f32.vlgmr.msra.gmra.mxu0 %vm1200_vm2, %v2030_v53 }
 0x881   : > { %v2017_v25 = vsel %vm2016_vm10, %v2929_v44, %v2013_v55 }
 0x882   : > { %v2019_v56 = vmul.f32 %v2017_v25, %v1985_v17 }
 0x884   : > { %v2025_v39 = vmul.f32 %v2886_v47, %v2019_v56 }
 0x886   : > { %v2031_v29 = vadd.f32 %v2887_v49, %v2025_v39 }
 0x888   : > { %2673 = vmatmul.msk.f32.gmra.mxu0 %vm1200_vm2, %v2031_v29 }
 0x8fd   : > { %v2063_v62 = vpop.f32.mrf.mxu0 }
 0x8fe   : > { %v2064_v63 = vadd.f32 %v2888_v60, %v2063_v62 }
 0x900   : > { %v2069_v0 = vmax.f32 %v2064_v63, 0.0 }
 0x902   : > { %2674 = vmatmul.msk.f32.vlgmr.msra.gmra.mxu1 %vm2083_vm11, %v2069_v0 }
 0x905   : > { %v2066_v1 = vpop.f32.mrf.mxu0 }
 0x906   : > { %v2067_v2 = vadd.f32 %v2888_v60, %v2066_v1 }
 0x908   : > { %v2070_v3 = vmax.f32 %v2067_v2, 0.0 }
 0x90a   : > { %2675 = vmatmul.msk.f32.gmra.mxu1 %vm2083_vm11, %v2070_v3 }
 0x97f   : > { %v2107_v6 = vpop.f32.mrf.mxu1 }
 0x980   : > { %v2108_v7 = vadd.f32 %v2889_v4, %v2107_v6 }
 0x982   : > { %v2113_v8 = vsel %vm1200_vm2, %v2108_v7, 0.0 }
 0x983   : > { %2114 = vadd.xlane.f32.xlu1 %v2113_v8 }
 0x987   : > { %v2110_v9 = vpop.f32.mrf.mxu1 }
 0x988   : > { %v2111_v10 = vadd.f32 %v2889_v4, %v2110_v9 }
 0x98a   : > { %v2116_v11 = vsel %vm1200_vm2, %v2111_v10, 0.0 }
 0x98b   : > { %2117 = vadd.xlane.f32.xlu1 %v2116_v11 }
 0x9f6   : > { %v2115_v12 = vpop.xlane.xlu1 %2114 }
 0x9f7   : > { %v2119_v13 = vmul.f32 %v2115_v12, %v4114_v5 }
 0x9f9   : > { %v2121_v14 = vsub.f32 %v2108_v7, %v2119_v13 }
 0x9fb   : > { %v2123_v15 = vmul.f32 %v2121_v14, %v2121_v14 }
 0x9fd   : > { %v2125_v16 = vsel %vm1200_vm2, %v2123_v15, 0.0 }
 0x9fe   : > { %2126 = vadd.xlane.f32.xlu1 %v2125_v16  ;;  %v2118_v41 = vpop.xlane.xlu1 %2117 }
 0x9ff   : > { %v2120_v17 = vmul.f32 %v2118_v41, %v4114_v5 }
 0xa01   : > { %v4158_v54 = vsub.f32 %v2111_v10, %v2120_v17 }
 0xa03   : > { %v2124_v18 = vmul.f32 %v4158_v54, %v4158_v54 }
 0xa05   : > { %v2128_v19 = vsel %vm1200_vm2, %v2124_v18, 0.0 }
 0xa06   : > { %2129 = vadd.xlane.f32.xlu1 %v2128_v19 }
 0xa07   : > { %3201 = shalt.err (!%p3198_p7)
}
 0xa08   : > { %s3382_s6 = smov 128   ;;  %s3383_s20 = smov 8  }
 0xa09   : > { %2716 = dma.vmem_to_hbm [thread:$0]  (%p3601_p12), %s2209_s30, 256, %s2211_s10, %s2177_s25, %s3382_s6, %s3382_s6, %s3383_s20  }
 0xa0a   : > { %s4461_s13 = scalar_lea.vmem [#allocation14], %s4449_s11  ;;  %s2694_s29 = sshll.u32 %s4454_s9, 4 }
 0xa0b   : > { %v2891_v61 = vld [vmem:[%s4461_s13] ss:$0 sm:$0xff]  ;;  %s4462_s2 = sld [smem:[#allocation52_spill]]  ;;  %s2189_s28 = sshll.u32 %s3890_s15, 4  ;;  %s2190_s28 = int_to_ptr.vmem [resolvable:$true] %s2189_s28 }
 0xa0c   : > { %s4463_s26 = sld [smem:[#allocation74_spill]] }
 0xa11   : > { %s2172_s9 = scalar_lea.sflag [#allocation4], %s4462_s2 }
 0xa12   : > { %s4464_s24 = smov %s4463_s26  ;;  %s2188_s4 = scalar_lea.hbm %s4463_s26, %s2694_s29 }
 0xa13   : > { %s2191_s23 = sshll.u32 %s2188_s4, 4  ;;  %s3222_s25 = scalar_lea.hbm %s4464_s24, 32  ;;  %s2192_s23 = int_to_ptr.hbm [resolvable:$true] %s2191_s23 }
 0xa14   : > { %s3216_s5 = sshra.s32 %s2192_s23, 4  ;;  %s3217_s5 = int_to_ptr.hbm [resolvable:$true] %s3216_s5 }
 0xa15   : > { %s3218_s30 = scalar_lea.hbm %s3217_s5, 16  ;;  %p3223_p6 = scmp.lt.s32.totalorder %s3217_s5, %s4464_s24 }
 0xa16   : > { %p3219_p12 = scmp.ne.s32.totalorder %s3217_s5, %s3218_s30  ;;  %p3224_p0 = scmp.lt.s32.totalorder %s3222_s25, %s3218_s30 }
 0xa18   : > { %p3220_p3 = pnand %p3219_p12, %p3589_p8  ;;  %p3225_p10 = por %p3224_p0, %p3223_p6 }
 0xa1a   : > { %p3221_p13 = pneg %p3220_p3 }
 0xa1c   : > { %p3226_p5 = pnand %p3225_p10, %p3221_p13 }
 0xa71   : > { %v2127_v20 = vpop.xlane.xlu1 %2126 }
 0xa72   : > { %v2131_v21 = vmul.f32 %v2127_v20, %v4114_v5 }
 0xa74   : > { %v2133_v23 = vadd.f32 1e-05, %v2131_v21 }
 0xa76   : > { %2930 = vrsqrt.f32 %v2133_v23  ;;  %vm2141_vm13 = vweird.f32 %v2133_v23 }
 0xa79   : > { %v2130_v24 = vpop.xlane.xlu1 %2129 }
 0xa7a   : > { %v2132_v26 = vmul.f32 %v2130_v24, %v4114_v5  ;;  %v2890_v5 = vld [vmem:[%s1167_s1] ss:$0 sm:$0xff] }
 0xa7c   : > { %v2931_v27 = vpop.eup %2930  ;;  %v2134_v28 = vadd.f32 1e-05, %v2132_v26 }
 0xa7d   : > { %v2136_v30 = vmul.f32 %v2931_v27, %v2133_v23  ;;  %vm2142_vm12 = vweird.f32 %v2931_v27 }
 0xa7e   : > { %2932 = vrsqrt.f32 %v2134_v28  ;;  %vm2143_vm14 = vmor %vm2141_vm13, %vm2142_vm12  ;;  %vm2151_vm0 = vweird.f32 %v2134_v28 }
 0xa7f   : > { %v2137_v31 = vmul.f32 %v2931_v27, %v2136_v30 }
 0xa81   : > { %v2138_v32 = vmul.f32 0.5, %v2137_v31 }
 0xa83   : > { %v2139_v33 = vsub.f32 1.5, %v2138_v32 }
 0xa84   : > { %v2933_v34 = vpop.eup %2932 }
 0xa85   : > { %v2140_v36 = vmul.f32 %v2931_v27, %v2139_v33  ;;  %v2146_v37 = vmul.f32 %v2933_v34, %v2134_v28  ;;  %vm2152_vm15 = vweird.f32 %v2933_v34 }
 0xa86   : > { %vm2153_vm1 = vmor %vm2151_vm0, %vm2152_vm15 }
 0xa87   : > { %v2144_v38 = vsel %vm2143_vm14, %v2931_v27, %v2140_v36  ;;  %v2147_v35 = vmul.f32 %v2933_v34, %v2146_v37 }
 0xa88   : > { %v2155_v42 = vmul.f32 %v2144_v38, %v2121_v14 }
 0xa89   : > { %v2148_v43 = vmul.f32 0.5, %v2147_v35 }
 0xa8a   : > { %v2161_v44 = vmul.f32 %v2890_v5, %v2155_v42 }
 0xa8b   : > { %v2149_v45 = vsub.f32 1.5, %v2148_v43 }
 0xa8c   : > { %v2167_v46 = vadd.f32 %v2891_v61, %v2161_v44 }
 0xa8d   : > { %v2150_v47 = vmul.f32 %v2933_v34, %v2149_v45 }
 0xa8e   : > { %2169 = vst.msk [vmem:[%s3890_s15] sm:$0xff] %vm1200_vm2, %v2167_v46 }
 0xa8f   : > { %v2154_v40 = vsel %vm2153_vm1, %v2933_v34, %v2150_v47 }
 0xa90   : > { %v2156_v48 = vmul.f32 %v2154_v40, %v4158_v54 }
 0xa92   : > { %v2162_v22 = vmul.f32 %v2890_v5, %v2156_v48 }
 0xa94   : > { %v2168_v49 = vadd.f32 %v2891_v61, %v2162_v22 }
 0xa96   : > { %2170 = vst.msk [vmem:[%s3890_s15 + $0x8] sm:$0xff] %vm1200_vm2, %v2168_v49 }
 0xa97   : > { %3229 = shalt.err (!%p3226_p5)
}
 0xa98   : > { %2715 = dma.vmem_to_hbm [thread:$0]  (%p3589_p8), %s2190_s28, 256, %s2192_s23, %s2172_s9, %s3382_s6, %s3382_s6, %s3383_s20  }
 0xa99 PF: > { %s4466_s15 = sld [smem:[#allocation39_spill]] }
 0xa9a   : > { %s4467_s14 = sld [smem:[#allocation32_spill]] }
 0xa9b   : > { %s4468_s19 = sld [smem:[#allocation43_spill]] }
 0xa9f   : > { %p2752_p9 = scmp.ge.s32.totalorder %s4466_s15, 2 }
 0xaa0   : > { %s2225_s8 = sand.u32 1, %s4467_s14  }
 0xaa1   : > { %p4469_p11 = scmp.ne.s32.totalorder %s4468_s19, 0  ;;  %s2226_s22 = scalar_lea.sflag [#allocation4], %s2225_s8 }
 0xaa3   : > { %p2745_p2 = pnand %p2752_p9, %p4469_p11 }
 0xaa5   : > { %p2746_p4 = pneg %p2745_p2 }
 0xaa7   : > { %3311 = dma.done.wait (%p2746_p4), %s2226_s22, 256  }
 0xaa8   : > { %3313 = vsyncadd (%p2746_p4), %s2226_s22, 4294967040  ;;  %s4470_s27 = sld [smem:[#allocation27_spill]] }
 0xaa9   : > { %s4471_s3 = sld [smem:[#allocation45_spill]] }
 0xaae   : > { %s2235_s17 = sand.u32 1, %s4470_s27  }
 0xaaf   : > { %p4472_p1 = scmp.ne.s32.totalorder %s4471_s3, 0  ;;  %s2236_s18 = scalar_lea.sflag [#allocation18], %s2235_s17 }
 0xab1   : > { %p2748_p7 = pnand %p2752_p9, %p4472_p1 }
 0xab3   : > { %p2749_p12 = pneg %p2748_p7 }
 0xab5   : > { %3315 = dma.done.wait (%p2749_p12), %s2236_s18, 256  }
 0xab6   : > { %3317 = vsyncadd (%p2749_p12), %s2236_s18, 4294967040  ;;  %s53_s1 = sadd.s32 1, %s4466_s15   ;;  %s4474_s2 = sld [smem:[#allocation28_spill]] }
 0xab7   : > { %p4225_p8 = scmp.ge.s32.totalorder %s53_s1, 6   ;;  %s4475_s25 = sld [smem:[#allocation29_spill]] }
 0xab8   : > { %s4476_s26 = sld [smem:[#allocation51_spill]] }
 0xab9   : > { %s4477_s27 = sld [smem:[#allocation30_spill]] }
 0xaba   : > { %s4478_s3 = sld [smem:[#allocation31_spill]] }
 0xabb   : > { %s4479_s28 = sld [smem:[#allocation49_spill]] }
 0xabc   : > { %s4480_s29 = sld [smem:[#allocation33_spill]] }
 0xabd   : > { %s4481_s0 = sld [smem:[#allocation34_spill]] }
 0xabe   : > { %s4482_s4 = sld [smem:[#allocation50_spill]]  ;;  %52 = sbr.rel (!%p4225_p8) target bundleno = 43 (0x2b), region = 287 }
 0xabf   : > { %s4483_s30 = sld [smem:[#allocation37_spill]] }
 0xac0   : > { %s4484_s5 = sld [smem:[#allocation38_spill]] }
 0xac1   : > { %s4485_s22 = sld [smem:[#allocation46_spill]] }
 0xac2   : > { %s4486_s23 = sld [smem:[#allocation48_spill]] }
 0xac3   :  { %2242 = vsyncpa [#allocation3], 1 }
 0xac4   :  { %2244 = vsyncpa [#allocation3 + $0x1], 1 }
 0xac5   :  { %2245 = vsyncpa [#allocation6], 1 }
 0xac6   :  { %2247 = vsyncpa [#allocation6 + $0x1], 1 }
 0xac7   :  { %2248 = vsyncpa [#allocation9], 1 }
 0xac8   :  { %2250 = vsyncpa [#allocation9 + $0x1], 1 }
 0xac9   :  { %2251 = vsyncpa [#allocation12], 1 }
 0xaca   :  { %2253 = vsyncpa [#allocation12 + $0x1], 1 }
 0xacb   :  { %2254 = vsyncpa [#allocation15], 1 }
 0xacc   :  { %2256 = vsyncpa [#allocation15 + $0x1], 1 }
 0xacd   :  { %2257 = vsyncpa [#allocation4], 1 }
 0xace   :  { %2259 = vsyncpa [#allocation4 + $0x1], 1 }
 0xacf   :  { %2260 = vsyncpa [#allocation18], 1 }
 0xad0   :  { %2262 = vsyncpa [#allocation18 + $0x1], 1 }

</bundles_post_ra>
